<compile_context>
chip_gen: v7x
topology: tpu7x:2x2x1
jax: 0.10.0
libtpu: 0.0.40
codegen_flags: <defaults>
</compile_context>

<pallas_src>
import numpy as np

import jax
import jax.numpy as jnp
from jax import lax
from jax.experimental import pallas as pl
from jax.experimental.pallas import tpu as pltpu


# ---------------------------------------------------------------------------
# Fused Pallas kernel: conv1+relu+pool -> conv2+relu+pool -> fc1 -> fc2 -> fc3
# ---------------------------------------------------------------------------
def _lenet_fused_kernel(xs_ref, w1_ref, b1_ref, w2_ref, b2_ref,
                        wf1_ref, bf1_ref, wf2_ref, bf2_ref, wf3_ref, bf3_ref,
                        out_ref):
    f32 = jnp.float32

    # ---- conv1 as banded matmuls; output rows grouped by (h mod 4) ----------------
    # A[g][t, L] = conv1 pre-bias output at row h = 4t+g,
    #              lane L = (w % 2)*128 + (w // 2)*6 + c   (lanes 72..127 / 200..255 = 0)
    A = []
    for g in range(4):
        acc = jnp.zeros((6, 256), f32)
        for i in range(5):
            m = (g + i) % 4            # row-parity class of input row 4t+g+i
            s = (g + i) // 4           # offset inside that class
            lhs = xs_ref[0, m, s:s + 6, :]                        # (6, 28)
            acc = acc + jnp.dot(lhs, w1_ref[i],
                                preferred_element_type=f32)       # (6, 256)
        A.append(acc)

    # ---- relu(conv1 + b1) + 2x2 max pool, fully folded -----------------------------
    # h-pool: rows 4t+0 / 4t+1 -> even pooled rows ; 4t+2 / 4t+3 -> odd pooled rows
    # w-pool: even-w lanes [0,128) vs odd-w lanes [128,256)
    def pool1(a_lo, a_hi):
        mx = jnp.maximum(a_lo, a_hi)                              # (6, 256)
        mx = jnp.maximum(mx[:, 0:128], mx[:, 128:256])            # (6, 128)
        return jnp.maximum(mx + b1_ref[...], 0.0)                 # (6, 128)

    p1_e = pool1(A[0], A[1])   # pooled rows 0,2,4,6,8,10 ; lane = w'*6 + c (rest = 0)
    p1_o = pool1(A[2], A[3])   # pooled rows 1,3,5,7,9,11

    # ---- conv2 as banded matmuls; output rows split by parity ----------------------
    # lane L = (w % 2)*128 + (w // 2)*16 + o   (lanes 64..127 / 192..255 = 0)
    def conv2_rows(select):
        acc = jnp.zeros((4, 256), f32)
        for i in range(5):
            src, off = select(i)
            acc = acc + jnp.dot(src[off:off + 4, :], w2_ref[i],
                                preferred_element_type=f32)       # (4, 256)
        return acc

    # even output rows h=2q read p1 rows 2q+i ; odd rows h=2q+1 read rows 2q+1+i
    B_e = conv2_rows(lambda i: (p1_e, i // 2) if i % 2 == 0 else (p1_o, i // 2))
    B_o = conv2_rows(lambda i: (p1_o, i // 2) if i % 2 == 0 else (p1_e, i // 2 + 1))

    m2 = jnp.maximum(B_e, B_o)                                    # (4, 256)
    m2 = jnp.maximum(m2[:, 0:128], m2[:, 128:256])                # (4, 128)
    p2 = jnp.maximum(m2 + b2_ref[...], 0.0)                       # rows = pooled h

    # ---- fc1 / fc2 / fc3 (flatten permutation folded into wf1 prep) ---------------
    y = bf1_ref[...]                                              # (1, 120)
    for q in range(4):
        y = y + jnp.dot(p2[q:q + 1, :], wf1_ref[q],
                        preferred_element_type=f32)
    y = jnp.maximum(y, 0.0)                                       # (1, 120)
    y = jnp.maximum(jnp.dot(y, wf2_ref[...], preferred_element_type=f32)
                    + bf2_ref[...], 0.0)                          # (1, 84)
    y = jnp.dot(y, wf3_ref[...], preferred_element_type=f32) + bf3_ref[...]   # (1, 10)
    out_ref[0] = y


def _fused_forward(xs, p):
    B = xs.shape[0]
    out = pl.pallas_call(
        _lenet_fused_kernel,
        out_shape=jax.ShapeDtypeStruct((B, 1, 10), jnp.float32),
        grid=(B,),
        in_specs=[
            pl.BlockSpec((1, 4, 7, 28), lambda b: (b, 0, 0, 0)),   # x, rows split mod 4
            pl.BlockSpec((5, 28, 256), lambda b: (0, 0, 0)),       # conv1 band matrices
            pl.BlockSpec((1, 128), lambda b: (0, 0)),              # conv1 bias lanes
            pl.BlockSpec((5, 128, 256), lambda b: (0, 0, 0)),      # conv2 band matrices
            pl.BlockSpec((1, 128), lambda b: (0, 0)),              # conv2 bias lanes
            pl.BlockSpec((4, 128, 120), lambda b: (0, 0, 0)),      # fc1 (permuted)
            pl.BlockSpec((1, 120), lambda b: (0, 0)),
            pl.BlockSpec((120, 84), lambda b: (0, 0)),             # fc2 (pre-transposed)
            pl.BlockSpec((1, 84), lambda b: (0, 0)),
            pl.BlockSpec((84, 10), lambda b: (0, 0)),              # fc3 (pre-transposed)
            pl.BlockSpec((1, 10), lambda b: (0, 0)),
        ],
        out_specs=pl.BlockSpec((1, 1, 10), lambda b: (b, 0, 0)),
        compiler_params=pltpu.CompilerParams(
            dimension_semantics=("parallel",)),
    )(xs, p["w1b"], p["b1l"], p["w2b"], p["b2l"],
      p["wf1p"], p["bf1"], p["wf2t"], p["bf2"], p["wf3t"], p["bf3"])
    return out.reshape(B, 10)


@jax.jit
def net_forward(prepped, x_nchw):
    B = x_nchw.shape[0]
    x = x_nchw.reshape(B, 28, 28)                       # C_in = 1
    # split rows by (row mod 4) so every pooling phase in the kernel is a contiguous slice
    xs = x.reshape(B, 7, 4, 28).transpose(0, 2, 1, 3)   # xs[b, m, k, :] = x[b, 4k+m, :]
    return _fused_forward(xs, prepped)


# ---------------------------------------------------------------------------
# One-time host-side weight preparation (banded conv matrices, folded permutations)
# ---------------------------------------------------------------------------
def prepare_params(params):
    w1 = np.asarray(params["w1"], np.float32)    # (6, 1, 5, 5)
    b1 = np.asarray(params["b1"], np.float32)    # (6,)
    w2 = np.asarray(params["w2"], np.float32)    # (16, 6, 5, 5)
    b2 = np.asarray(params["b2"], np.float32)    # (16,)
    wf1 = np.asarray(params["wf1"], np.float32)  # (120, 256)
    wf2 = np.asarray(params["wf2"], np.float32)  # (84, 120)
    wf3 = np.asarray(params["wf3"], np.float32)  # (10, 84)

    # conv1 bands: column lane = (w % 2)*128 + (w // 2)*6 + c ; row = input column u
    w1b = np.zeros((5, 28, 256), np.float32)
    for i in range(5):
        for w in range(24):
            lane0 = (w % 2) * 128 + (w // 2) * 6
            for j in range(5):
                w1b[i, w + j, lane0:lane0 + 6] = w1[:, 0, i, j]
    b1l = np.zeros((1, 128), np.float32)
    b1l[0, :72] = np.tile(b1, 12)

    # conv2 bands: row = w'*6 + c (p1 lane layout) ; column lane = (w%2)*128 + (w//2)*16 + o
    w2b = np.zeros((5, 128, 256), np.float32)
    for i in range(5):
        for w in range(8):
            lane0 = (w % 2) * 128 + (w // 2) * 16
            for j in range(5):
                wp = w + j
                for c in range(6):
                    w2b[i, wp * 6 + c, lane0:lane0 + 16] = w2[:, c, i, j]
    b2l = np.zeros((1, 128), np.float32)
    b2l[0, :64] = np.tile(b2, 4)

    # fc1: fold torch.flatten's (C,H,W) ordering + our (h, w*16+o) lane layout in
    wf1p = np.zeros((4, 128, 120), np.float32)
    for q in range(4):          # pooled h
        for wq in range(4):     # pooled w
            for o in range(16):
                wf1p[q, wq * 16 + o, :] = wf1[:, o * 16 + q * 4 + wq]

    return {
        "w1b": jnp.asarray(w1b), "b1l": jnp.asarray(b1l),
        "w2b": jnp.asarray(w2b), "b2l": jnp.asarray(b2l),
        "wf1p": jnp.asarray(wf1p),
        "bf1": jnp.asarray(np.asarray(params["bf1"], np.float32).reshape(1, 120)),
        "wf2t": jnp.asarray(np.ascontiguousarray(wf2.T)),
        "bf2": jnp.asarray(np.asarray(params["bf2"], np.float32).reshape(1, 84)),
        "wf3t": jnp.asarray(np.ascontiguousarray(wf3.T)),
        "bf3": jnp.asarray(np.asarray(params["bf3"], np.float32).reshape(1, 10)),
    }


# ---------------------------------------------------------------------------
# Pure-JAX reference (for correctness check only)
# ---------------------------------------------------------------------------
def net_forward_ref(params, x):
    def conv(x, w, b):
        y = lax.conv_general_dilated(x, w, (1, 1), "VALID",
                                     dimension_numbers=("NCHW", "OIHW", "NCHW"))
        return jnp.maximum(y + b.reshape(1, -1, 1, 1), 0.0)

    def pool(x):
        return lax.reduce_window(x, -jnp.inf, lax.max,
                                 (1, 1, 2, 2), (1, 1, 2, 2), "VALID")

    x = pool(conv(x, params["w1"], params["b1"]))
    x = pool(conv(x, params["w2"], params["b2"]))
    x = x.reshape(x.shape[0], -1)
    x = jnp.maximum(x @ params["wf1"].T + params["bf1"], 0.0)
    x = jnp.maximum(x @ params["wf2"].T + params["bf2"], 0.0)
    x = x @ params["wf3"].T + params["bf3"]
    return x


# ---------------------------------------------------------------------------
def init_params(key):
    ks = jax.random.split(key, 10)
    def rnd(k, shape, scale):
        return scale * jax.random.normal(k, shape, dtype=jnp.float32)
    return {
        "w1": rnd(ks[0], (6, 1, 5, 5), 0.2),   "b1": rnd(ks[1], (6,), 0.1),
        "w2": rnd(ks[2], (16, 6, 5, 5), 0.08), "b2": rnd(ks[3], (16,), 0.1),
        "wf1": rnd(ks[4], (120, 256), 0.06),   "bf1": rnd(ks[5], (120,), 0.1),
        "wf2": rnd(ks[6], (84, 120), 0.09),    "bf2": rnd(ks[7], (84,), 0.1),
        "wf3": rnd(ks[8], (10, 84), 0.1),      "bf3": rnd(ks[9], (10,), 0.1),
    }


if __name__ == "__main__":
    key = jax.random.PRNGKey(0)
    kp, kx = jax.random.split(key)
    params = init_params(kp)
    prepped = prepare_params(params)     # one-time host-side weight re-layout
    # Input must be 28x28 so that conv/pool/conv/pool yields 16*4*4 = 256 features.
    x = jax.random.normal(kx, (2, 1, 28, 28), dtype=jnp.float32)

    out = net_forward(prepped, x)
    out = jax.block_until_ready(out)

    ref = net_forward_ref(params, x)
    assert out.shape == (2, 10), out.shape
    err = float(jnp.max(jnp.abs(out - ref)))
    assert jnp.allclose(out, ref, atol=1e-3, rtol=1e-3), err
    print("KERNEL_OK")
</pallas_src>

<mosaic_0001>
module attributes {stable_mosaic.version = 11 : i64} {
  func.func @_lenet_fused_kernel(%arg0: i32, %arg1: memref<1x4x7x28xf32, #tpu.memory_space<vmem>>, %arg2: memref<5x28x256xf32, #tpu.memory_space<vmem>>, %arg3: memref<1x128xf32, #tpu.memory_space<vmem>>, %arg4: memref<5x128x256xf32, #tpu.memory_space<vmem>>, %arg5: memref<1x128xf32, #tpu.memory_space<vmem>>, %arg6: memref<4x128x120xf32, #tpu.memory_space<vmem>>, %arg7: memref<1x120xf32, #tpu.memory_space<vmem>>, %arg8: memref<120x84xf32, #tpu.memory_space<vmem>>, %arg9: memref<1x84xf32, #tpu.memory_space<vmem>>, %arg10: memref<84x10xf32, #tpu.memory_space<vmem>>, %arg11: memref<1x10xf32, #tpu.memory_space<vmem>>, %arg12: memref<1x1x10xf32, #tpu.memory_space<vmem>>) attributes {dimension_semantics = [#tpu.dimension_semantics<parallel>], iteration_bounds = array<i64: 2>, scalar_prefetch = 0 : i64, scratch_operands = 0 : i64, tpu.core_type = #tpu.core_type<tc>, window_params = [{transform_indices = @transform_0, window_bounds = array<i64: 1, 4, 7, 28>}, {pipeline_mode = #tpu.pipeline_mode<synchronous>, transform_indices = @transform_1, window_bounds = array<i64: 5, 28, 256>}, {pipeline_mode = #tpu.pipeline_mode<synchronous>, transform_indices = @transform_2, window_bounds = array<i64: 1, 128>}, {pipeline_mode = #tpu.pipeline_mode<synchronous>, transform_indices = @transform_3, window_bounds = array<i64: 5, 128, 256>}, {pipeline_mode = #tpu.pipeline_mode<synchronous>, transform_indices = @transform_4, window_bounds = array<i64: 1, 128>}, {pipeline_mode = #tpu.pipeline_mode<synchronous>, transform_indices = @transform_5, window_bounds = array<i64: 4, 128, 120>}, {pipeline_mode = #tpu.pipeline_mode<synchronous>, transform_indices = @transform_6, window_bounds = array<i64: 1, 120>}, {pipeline_mode = #tpu.pipeline_mode<synchronous>, transform_indices = @transform_7, window_bounds = array<i64: 120, 84>}, {pipeline_mode = #tpu.pipeline_mode<synchronous>, transform_indices = @transform_8, window_bounds = array<i64: 1, 84>}, {pipeline_mode = #tpu.pipeline_mode<synchronous>, transform_indices = @transform_9, window_bounds = array<i64: 84, 10>}, {pipeline_mode = #tpu.pipeline_mode<synchronous>, transform_indices = @transform_10, window_bounds = array<i64: 1, 10>}, {transform_indices = @transform_11, window_bounds = array<i64: 1, 1, 10>}]} {
    %cst = arith.constant 0.000000e+00 : f32
    %0 = vector.broadcast %cst : f32 to vector<6x256xf32>
    %c0 = arith.constant 0 : index
    %c0_0 = arith.constant 0 : index
    %c0_1 = arith.constant 0 : index
    %c0_2 = arith.constant 0 : index
    %1 = vector.load %arg1[%c0, %c0_0, %c0_1, %c0_2] : memref<1x4x7x28xf32, #tpu.memory_space<vmem>>, vector<1x1x6x28xf32>
    %2 = vector.shape_cast %1 : vector<1x1x6x28xf32> to vector<6x28xf32>
    %c0_3 = arith.constant 0 : index
    %c0_4 = arith.constant 0 : index
    %c0_5 = arith.constant 0 : index
    %3 = vector.load %arg2[%c0_3, %c0_4, %c0_5] : memref<5x28x256xf32, #tpu.memory_space<vmem>>, vector<1x28x256xf32>
    %4 = vector.shape_cast %3 : vector<1x28x256xf32> to vector<28x256xf32>
    %cst_6 = arith.constant dense<0.000000e+00> : vector<6x256xf32>
    %5 = tpu.matmul %2, %4, %cst_6 {dimension_numbers = #tpu.dot_dimension_numbers<[1], [0], [0], [1], [0, 0, 1, 1], [], []>} : vector<6x28xf32>, vector<28x256xf32>, vector<6x256xf32> -> vector<6x256xf32>
    %6 = arith.addf %0, %5 : vector<6x256xf32>
    %c0_7 = arith.constant 0 : index
    %c1 = arith.constant 1 : index
    %c0_8 = arith.constant 0 : index
    %c0_9 = arith.constant 0 : index
    %7 = vector.load %arg1[%c0_7, %c1, %c0_8, %c0_9] : memref<1x4x7x28xf32, #tpu.memory_space<vmem>>, vector<1x1x6x28xf32>
    %8 = vector.shape_cast %7 : vector<1x1x6x28xf32> to vector<6x28xf32>
    %c1_10 = arith.constant 1 : index
    %c0_11 = arith.constant 0 : index
    %c0_12 = arith.constant 0 : index
    %9 = vector.load %arg2[%c1_10, %c0_11, %c0_12] : memref<5x28x256xf32, #tpu.memory_space<vmem>>, vector<1x28x256xf32>
    %10 = vector.shape_cast %9 : vector<1x28x256xf32> to vector<28x256xf32>
    %cst_13 = arith.constant dense<0.000000e+00> : vector<6x256xf32>
    %11 = tpu.matmul %8, %10, %cst_13 {dimension_numbers = #tpu.dot_dimension_numbers<[1], [0], [0], [1], [0, 0, 1, 1], [], []>} : vector<6x28xf32>, vector<28x256xf32>, vector<6x256xf32> -> vector<6x256xf32>
    %12 = arith.addf %6, %11 : vector<6x256xf32>
    %c0_14 = arith.constant 0 : index
    %c2 = arith.constant 2 : index
    %c0_15 = arith.constant 0 : index
    %c0_16 = arith.constant 0 : index
    %13 = vector.load %arg1[%c0_14, %c2, %c0_15, %c0_16] : memref<1x4x7x28xf32, #tpu.memory_space<vmem>>, vector<1x1x6x28xf32>
    %14 = vector.shape_cast %13 : vector<1x1x6x28xf32> to vector<6x28xf32>
    %c2_17 = arith.constant 2 : index
    %c0_18 = arith.constant 0 : index
    %c0_19 = arith.constant 0 : index
    %15 = vector.load %arg2[%c2_17, %c0_18, %c0_19] : memref<5x28x256xf32, #tpu.memory_space<vmem>>, vector<1x28x256xf32>
    %16 = vector.shape_cast %15 : vector<1x28x256xf32> to vector<28x256xf32>
    %cst_20 = arith.constant dense<0.000000e+00> : vector<6x256xf32>
    %17 = tpu.matmul %14, %16, %cst_20 {dimension_numbers = #tpu.dot_dimension_numbers<[1], [0], [0], [1], [0, 0, 1, 1], [], []>} : vector<6x28xf32>, vector<28x256xf32>, vector<6x256xf32> -> vector<6x256xf32>
    %18 = arith.addf %12, %17 : vector<6x256xf32>
    %c0_21 = arith.constant 0 : index
    %c3 = arith.constant 3 : index
    %c0_22 = arith.constant 0 : index
    %c0_23 = arith.constant 0 : index
    %19 = vector.load %arg1[%c0_21, %c3, %c0_22, %c0_23] : memref<1x4x7x28xf32, #tpu.memory_space<vmem>>, vector<1x1x6x28xf32>
    %20 = vector.shape_cast %19 : vector<1x1x6x28xf32> to vector<6x28xf32>
    %c3_24 = arith.constant 3 : index
    %c0_25 = arith.constant 0 : index
    %c0_26 = arith.constant 0 : index
    %21 = vector.load %arg2[%c3_24, %c0_25, %c0_26] : memref<5x28x256xf32, #tpu.memory_space<vmem>>, vector<1x28x256xf32>
    %22 = vector.shape_cast %21 : vector<1x28x256xf32> to vector<28x256xf32>
    %cst_27 = arith.constant dense<0.000000e+00> : vector<6x256xf32>
    %23 = tpu.matmul %20, %22, %cst_27 {dimension_numbers = #tpu.dot_dimension_numbers<[1], [0], [0], [1], [0, 0, 1, 1], [], []>} : vector<6x28xf32>, vector<28x256xf32>, vector<6x256xf32> -> vector<6x256xf32>
    %24 = arith.addf %18, %23 : vector<6x256xf32>
    %c0_28 = arith.constant 0 : index
    %c0_29 = arith.constant 0 : index
    %c1_30 = arith.constant 1 : index
    %c0_31 = arith.constant 0 : index
    %25 = vector.load %arg1[%c0_28, %c0_29, %c1_30, %c0_31] : memref<1x4x7x28xf32, #tpu.memory_space<vmem>>, vector<1x1x6x28xf32>
    %26 = vector.shape_cast %25 : vector<1x1x6x28xf32> to vector<6x28xf32>
    %c4 = arith.constant 4 : index
    %c0_32 = arith.constant 0 : index
    %c0_33 = arith.constant 0 : index
    %27 = vector.load %arg2[%c4, %c0_32, %c0_33] : memref<5x28x256xf32, #tpu.memory_space<vmem>>, vector<1x28x256xf32>
    %28 = vector.shape_cast %27 : vector<1x28x256xf32> to vector<28x256xf32>
    %cst_34 = arith.constant dense<0.000000e+00> : vector<6x256xf32>
    %29 = tpu.matmul %26, %28, %cst_34 {dimension_numbers = #tpu.dot_dimension_numbers<[1], [0], [0], [1], [0, 0, 1, 1], [], []>} : vector<6x28xf32>, vector<28x256xf32>, vector<6x256xf32> -> vector<6x256xf32>
    %30 = arith.addf %24, %29 : vector<6x256xf32>
    %cst_35 = arith.constant 0.000000e+00 : f32
    %31 = vector.broadcast %cst_35 : f32 to vector<6x256xf32>
    %c0_36 = arith.constant 0 : index
    %c1_37 = arith.constant 1 : index
    %c0_38 = arith.constant 0 : index
    %c0_39 = arith.constant 0 : index
    %32 = vector.load %arg1[%c0_36, %c1_37, %c0_38, %c0_39] : memref<1x4x7x28xf32, #tpu.memory_space<vmem>>, vector<1x1x6x28xf32>
    %33 = vector.shape_cast %32 : vector<1x1x6x28xf32> to vector<6x28xf32>
    %c0_40 = arith.constant 0 : index
    %c0_41 = arith.constant 0 : index
    %c0_42 = arith.constant 0 : index
    %34 = vector.load %arg2[%c0_40, %c0_41, %c0_42] : memref<5x28x256xf32, #tpu.memory_space<vmem>>, vector<1x28x256xf32>
    %35 = vector.shape_cast %34 : vector<1x28x256xf32> to vector<28x256xf32>
    %cst_43 = arith.constant dense<0.000000e+00> : vector<6x256xf32>
    %36 = tpu.matmul %33, %35, %cst_43 {dimension_numbers = #tpu.dot_dimension_numbers<[1], [0], [0], [1], [0, 0, 1, 1], [], []>} : vector<6x28xf32>, vector<28x256xf32>, vector<6x256xf32> -> vector<6x256xf32>
    %37 = arith.addf %31, %36 : vector<6x256xf32>
    %c0_44 = arith.constant 0 : index
    %c2_45 = arith.constant 2 : index
    %c0_46 = arith.constant 0 : index
    %c0_47 = arith.constant 0 : index
    %38 = vector.load %arg1[%c0_44, %c2_45, %c0_46, %c0_47] : memref<1x4x7x28xf32, #tpu.memory_space<vmem>>, vector<1x1x6x28xf32>
    %39 = vector.shape_cast %38 : vector<1x1x6x28xf32> to vector<6x28xf32>
    %c1_48 = arith.constant 1 : index
    %c0_49 = arith.constant 0 : index
    %c0_50 = arith.constant 0 : index
    %40 = vector.load %arg2[%c1_48, %c0_49, %c0_50] : memref<5x28x256xf32, #tpu.memory_space<vmem>>, vector<1x28x256xf32>
    %41 = vector.shape_cast %40 : vector<1x28x256xf32> to vector<28x256xf32>
    %cst_51 = arith.constant dense<0.000000e+00> : vector<6x256xf32>
    %42 = tpu.matmul %39, %41, %cst_51 {dimension_numbers = #tpu.dot_dimension_numbers<[1], [0], [0], [1], [0, 0, 1, 1], [], []>} : vector<6x28xf32>, vector<28x256xf32>, vector<6x256xf32> -> vector<6x256xf32>
    %43 = arith.addf %37, %42 : vector<6x256xf32>
    %c0_52 = arith.constant 0 : index
    %c3_53 = arith.constant 3 : index
    %c0_54 = arith.constant 0 : index
    %c0_55 = arith.constant 0 : index
    %44 = vector.load %arg1[%c0_52, %c3_53, %c0_54, %c0_55] : memref<1x4x7x28xf32, #tpu.memory_space<vmem>>, vector<1x1x6x28xf32>
    %45 = vector.shape_cast %44 : vector<1x1x6x28xf32> to vector<6x28xf32>
    %c2_56 = arith.constant 2 : index
    %c0_57 = arith.constant 0 : index
    %c0_58 = arith.constant 0 : index
    %46 = vector.load %arg2[%c2_56, %c0_57, %c0_58] : memref<5x28x256xf32, #tpu.memory_space<vmem>>, vector<1x28x256xf32>
    %47 = vector.shape_cast %46 : vector<1x28x256xf32> to vector<28x256xf32>
    %cst_59 = arith.constant dense<0.000000e+00> : vector<6x256xf32>
    %48 = tpu.matmul %45, %47, %cst_59 {dimension_numbers = #tpu.dot_dimension_numbers<[1], [0], [0], [1], [0, 0, 1, 1], [], []>} : vector<6x28xf32>, vector<28x256xf32>, vector<6x256xf32> -> vector<6x256xf32>
    %49 = arith.addf %43, %48 : vector<6x256xf32>
    %c0_60 = arith.constant 0 : index
    %c0_61 = arith.constant 0 : index
    %c1_62 = arith.constant 1 : index
    %c0_63 = arith.constant 0 : index
    %50 = vector.load %arg1[%c0_60, %c0_61, %c1_62, %c0_63] : memref<1x4x7x28xf32, #tpu.memory_space<vmem>>, vector<1x1x6x28xf32>
    %51 = vector.shape_cast %50 : vector<1x1x6x28xf32> to vector<6x28xf32>
    %c3_64 = arith.constant 3 : index
    %c0_65 = arith.constant 0 : index
    %c0_66 = arith.constant 0 : index
    %52 = vector.load %arg2[%c3_64, %c0_65, %c0_66] : memref<5x28x256xf32, #tpu.memory_space<vmem>>, vector<1x28x256xf32>
    %53 = vector.shape_cast %52 : vector<1x28x256xf32> to vector<28x256xf32>
    %cst_67 = arith.constant dense<0.000000e+00> : vector<6x256xf32>
    %54 = tpu.matmul %51, %53, %cst_67 {dimension_numbers = #tpu.dot_dimension_numbers<[1], [0], [0], [1], [0, 0, 1, 1], [], []>} : vector<6x28xf32>, vector<28x256xf32>, vector<6x256xf32> -> vector<6x256xf32>
    %55 = arith.addf %49, %54 : vector<6x256xf32>
    %c0_68 = arith.constant 0 : index
    %c1_69 = arith.constant 1 : index
    %c1_70 = arith.constant 1 : index
    %c0_71 = arith.constant 0 : index
    %56 = vector.load %arg1[%c0_68, %c1_69, %c1_70, %c0_71] : memref<1x4x7x28xf32, #tpu.memory_space<vmem>>, vector<1x1x6x28xf32>
    %57 = vector.shape_cast %56 : vector<1x1x6x28xf32> to vector<6x28xf32>
    %c4_72 = arith.constant 4 : index
    %c0_73 = arith.constant 0 : index
    %c0_74 = arith.constant 0 : index
    %58 = vector.load %arg2[%c4_72, %c0_73, %c0_74] : memref<5x28x256xf32, #tpu.memory_space<vmem>>, vector<1x28x256xf32>
    %59 = vector.shape_cast %58 : vector<1x28x256xf32> to vector<28x256xf32>
    %cst_75 = arith.constant dense<0.000000e+00> : vector<6x256xf32>
    %60 = tpu.matmul %57, %59, %cst_75 {dimension_numbers = #tpu.dot_dimension_numbers<[1], [0], [0], [1], [0, 0, 1, 1], [], []>} : vector<6x28xf32>, vector<28x256xf32>, vector<6x256xf32> -> vector<6x256xf32>
    %61 = arith.addf %55, %60 : vector<6x256xf32>
    %cst_76 = arith.constant 0.000000e+00 : f32
    %62 = vector.broadcast %cst_76 : f32 to vector<6x256xf32>
    %c0_77 = arith.constant 0 : index
    %c2_78 = arith.constant 2 : index
    %c0_79 = arith.constant 0 : index
    %c0_80 = arith.constant 0 : index
    %63 = vector.load %arg1[%c0_77, %c2_78, %c0_79, %c0_80] : memref<1x4x7x28xf32, #tpu.memory_space<vmem>>, vector<1x1x6x28xf32>
    %64 = vector.shape_cast %63 : vector<1x1x6x28xf32> to vector<6x28xf32>
    %c0_81 = arith.constant 0 : index
    %c0_82 = arith.constant 0 : index
    %c0_83 = arith.constant 0 : index
    %65 = vector.load %arg2[%c0_81, %c0_82, %c0_83] : memref<5x28x256xf32, #tpu.memory_space<vmem>>, vector<1x28x256xf32>
    %66 = vector.shape_cast %65 : vector<1x28x256xf32> to vector<28x256xf32>
    %cst_84 = arith.constant dense<0.000000e+00> : vector<6x256xf32>
    %67 = tpu.matmul %64, %66, %cst_84 {dimension_numbers = #tpu.dot_dimension_numbers<[1], [0], [0], [1], [0, 0, 1, 1], [], []>} : vector<6x28xf32>, vector<28x256xf32>, vector<6x256xf32> -> vector<6x256xf32>
    %68 = arith.addf %62, %67 : vector<6x256xf32>
    %c0_85 = arith.constant 0 : index
    %c3_86 = arith.constant 3 : index
    %c0_87 = arith.constant 0 : index
    %c0_88 = arith.constant 0 : index
    %69 = vector.load %arg1[%c0_85, %c3_86, %c0_87, %c0_88] : memref<1x4x7x28xf32, #tpu.memory_space<vmem>>, vector<1x1x6x28xf32>
    %70 = vector.shape_cast %69 : vector<1x1x6x28xf32> to vector<6x28xf32>
    %c1_89 = arith.constant 1 : index
    %c0_90 = arith.constant 0 : index
    %c0_91 = arith.constant 0 : index
    %71 = vector.load %arg2[%c1_89, %c0_90, %c0_91] : memref<5x28x256xf32, #tpu.memory_space<vmem>>, vector<1x28x256xf32>
    %72 = vector.shape_cast %71 : vector<1x28x256xf32> to vector<28x256xf32>
    %cst_92 = arith.constant dense<0.000000e+00> : vector<6x256xf32>
    %73 = tpu.matmul %70, %72, %cst_92 {dimension_numbers = #tpu.dot_dimension_numbers<[1], [0], [0], [1], [0, 0, 1, 1], [], []>} : vector<6x28xf32>, vector<28x256xf32>, vector<6x256xf32> -> vector<6x256xf32>
    %74 = arith.addf %68, %73 : vector<6x256xf32>
    %c0_93 = arith.constant 0 : index
    %c0_94 = arith.constant 0 : index
    %c1_95 = arith.constant 1 : index
    %c0_96 = arith.constant 0 : index
    %75 = vector.load %arg1[%c0_93, %c0_94, %c1_95, %c0_96] : memref<1x4x7x28xf32, #tpu.memory_space<vmem>>, vector<1x1x6x28xf32>
    %76 = vector.shape_cast %75 : vector<1x1x6x28xf32> to vector<6x28xf32>
    %c2_97 = arith.constant 2 : index
    %c0_98 = arith.constant 0 : index
    %c0_99 = arith.constant 0 : index
    %77 = vector.load %arg2[%c2_97, %c0_98, %c0_99] : memref<5x28x256xf32, #tpu.memory_space<vmem>>, vector<1x28x256xf32>
    %78 = vector.shape_cast %77 : vector<1x28x256xf32> to vector<28x256xf32>
    %cst_100 = arith.constant dense<0.000000e+00> : vector<6x256xf32>
    %79 = tpu.matmul %76, %78, %cst_100 {dimension_numbers = #tpu.dot_dimension_numbers<[1], [0], [0], [1], [0, 0, 1, 1], [], []>} : vector<6x28xf32>, vector<28x256xf32>, vector<6x256xf32> -> vector<6x256xf32>
    %80 = arith.addf %74, %79 : vector<6x256xf32>
    %c0_101 = arith.constant 0 : index
    %c1_102 = arith.constant 1 : index
    %c1_103 = arith.constant 1 : index
    %c0_104 = arith.constant 0 : index
    %81 = vector.load %arg1[%c0_101, %c1_102, %c1_103, %c0_104] : memref<1x4x7x28xf32, #tpu.memory_space<vmem>>, vector<1x1x6x28xf32>
    %82 = vector.shape_cast %81 : vector<1x1x6x28xf32> to vector<6x28xf32>
    %c3_105 = arith.constant 3 : index
    %c0_106 = arith.constant 0 : index
    %c0_107 = arith.constant 0 : index
    %83 = vector.load %arg2[%c3_105, %c0_106, %c0_107] : memref<5x28x256xf32, #tpu.memory_space<vmem>>, vector<1x28x256xf32>
    %84 = vector.shape_cast %83 : vector<1x28x256xf32> to vector<28x256xf32>
    %cst_108 = arith.constant dense<0.000000e+00> : vector<6x256xf32>
    %85 = tpu.matmul %82, %84, %cst_108 {dimension_numbers = #tpu.dot_dimension_numbers<[1], [0], [0], [1], [0, 0, 1, 1], [], []>} : vector<6x28xf32>, vector<28x256xf32>, vector<6x256xf32> -> vector<6x256xf32>
    %86 = arith.addf %80, %85 : vector<6x256xf32>
    %c0_109 = arith.constant 0 : index
    %c2_110 = arith.constant 2 : index
    %c1_111 = arith.constant 1 : index
    %c0_112 = arith.constant 0 : index
    %87 = vector.load %arg1[%c0_109, %c2_110, %c1_111, %c0_112] : memref<1x4x7x28xf32, #tpu.memory_space<vmem>>, vector<1x1x6x28xf32>
    %88 = vector.shape_cast %87 : vector<1x1x6x28xf32> to vector<6x28xf32>
    %c4_113 = arith.constant 4 : index
    %c0_114 = arith.constant 0 : index
    %c0_115 = arith.constant 0 : index
    %89 = vector.load %arg2[%c4_113, %c0_114, %c0_115] : memref<5x28x256xf32, #tpu.memory_space<vmem>>, vector<1x28x256xf32>
    %90 = vector.shape_cast %89 : vector<1x28x256xf32> to vector<28x256xf32>
    %cst_116 = arith.constant dense<0.000000e+00> : vector<6x256xf32>
    %91 = tpu.matmul %88, %90, %cst_116 {dimension_numbers = #tpu.dot_dimension_numbers<[1], [0], [0], [1], [0, 0, 1, 1], [], []>} : vector<6x28xf32>, vector<28x256xf32>, vector<6x256xf32> -> vector<6x256xf32>
    %92 = arith.addf %86, %91 : vector<6x256xf32>
    %cst_117 = arith.constant 0.000000e+00 : f32
    %93 = vector.broadcast %cst_117 : f32 to vector<6x256xf32>
    %c0_118 = arith.constant 0 : index
    %c3_119 = arith.constant 3 : index
    %c0_120 = arith.constant 0 : index
    %c0_121 = arith.constant 0 : index
    %94 = vector.load %arg1[%c0_118, %c3_119, %c0_120, %c0_121] : memref<1x4x7x28xf32, #tpu.memory_space<vmem>>, vector<1x1x6x28xf32>
    %95 = vector.shape_cast %94 : vector<1x1x6x28xf32> to vector<6x28xf32>
    %c0_122 = arith.constant 0 : index
    %c0_123 = arith.constant 0 : index
    %c0_124 = arith.constant 0 : index
    %96 = vector.load %arg2[%c0_122, %c0_123, %c0_124] : memref<5x28x256xf32, #tpu.memory_space<vmem>>, vector<1x28x256xf32>
    %97 = vector.shape_cast %96 : vector<1x28x256xf32> to vector<28x256xf32>
    %cst_125 = arith.constant dense<0.000000e+00> : vector<6x256xf32>
    %98 = tpu.matmul %95, %97, %cst_125 {dimension_numbers = #tpu.dot_dimension_numbers<[1], [0], [0], [1], [0, 0, 1, 1], [], []>} : vector<6x28xf32>, vector<28x256xf32>, vector<6x256xf32> -> vector<6x256xf32>
    %99 = arith.addf %93, %98 : vector<6x256xf32>
    %c0_126 = arith.constant 0 : index
    %c0_127 = arith.constant 0 : index
    %c1_128 = arith.constant 1 : index
    %c0_129 = arith.constant 0 : index
    %100 = vector.load %arg1[%c0_126, %c0_127, %c1_128, %c0_129] : memref<1x4x7x28xf32, #tpu.memory_space<vmem>>, vector<1x1x6x28xf32>
    %101 = vector.shape_cast %100 : vector<1x1x6x28xf32> to vector<6x28xf32>
    %c1_130 = arith.constant 1 : index
    %c0_131 = arith.constant 0 : index
    %c0_132 = arith.constant 0 : index
    %102 = vector.load %arg2[%c1_130, %c0_131, %c0_132] : memref<5x28x256xf32, #tpu.memory_space<vmem>>, vector<1x28x256xf32>
    %103 = vector.shape_cast %102 : vector<1x28x256xf32> to vector<28x256xf32>
    %cst_133 = arith.constant dense<0.000000e+00> : vector<6x256xf32>
    %104 = tpu.matmul %101, %103, %cst_133 {dimension_numbers = #tpu.dot_dimension_numbers<[1], [0], [0], [1], [0, 0, 1, 1], [], []>} : vector<6x28xf32>, vector<28x256xf32>, vector<6x256xf32> -> vector<6x256xf32>
    %105 = arith.addf %99, %104 : vector<6x256xf32>
    %c0_134 = arith.constant 0 : index
    %c1_135 = arith.constant 1 : index
    %c1_136 = arith.constant 1 : index
    %c0_137 = arith.constant 0 : index
    %106 = vector.load %arg1[%c0_134, %c1_135, %c1_136, %c0_137] : memref<1x4x7x28xf32, #tpu.memory_space<vmem>>, vector<1x1x6x28xf32>
    %107 = vector.shape_cast %106 : vector<1x1x6x28xf32> to vector<6x28xf32>
    %c2_138 = arith.constant 2 : index
    %c0_139 = arith.constant 0 : index
    %c0_140 = arith.constant 0 : index
    %108 = vector.load %arg2[%c2_138, %c0_139, %c0_140] : memref<5x28x256xf32, #tpu.memory_space<vmem>>, vector<1x28x256xf32>
    %109 = vector.shape_cast %108 : vector<1x28x256xf32> to vector<28x256xf32>
    %cst_141 = arith.constant dense<0.000000e+00> : vector<6x256xf32>
    %110 = tpu.matmul %107, %109, %cst_141 {dimension_numbers = #tpu.dot_dimension_numbers<[1], [0], [0], [1], [0, 0, 1, 1], [], []>} : vector<6x28xf32>, vector<28x256xf32>, vector<6x256xf32> -> vector<6x256xf32>
    %111 = arith.addf %105, %110 : vector<6x256xf32>
    %c0_142 = arith.constant 0 : index
    %c2_143 = arith.constant 2 : index
    %c1_144 = arith.constant 1 : index
    %c0_145 = arith.constant 0 : index
    %112 = vector.load %arg1[%c0_142, %c2_143, %c1_144, %c0_145] : memref<1x4x7x28xf32, #tpu.memory_space<vmem>>, vector<1x1x6x28xf32>
    %113 = vector.shape_cast %112 : vector<1x1x6x28xf32> to vector<6x28xf32>
    %c3_146 = arith.constant 3 : index
    %c0_147 = arith.constant 0 : index
    %c0_148 = arith.constant 0 : index
    %114 = vector.load %arg2[%c3_146, %c0_147, %c0_148] : memref<5x28x256xf32, #tpu.memory_space<vmem>>, vector<1x28x256xf32>
    %115 = vector.shape_cast %114 : vector<1x28x256xf32> to vector<28x256xf32>
    %cst_149 = arith.constant dense<0.000000e+00> : vector<6x256xf32>
    %116 = tpu.matmul %113, %115, %cst_149 {dimension_numbers = #tpu.dot_dimension_numbers<[1], [0], [0], [1], [0, 0, 1, 1], [], []>} : vector<6x28xf32>, vector<28x256xf32>, vector<6x256xf32> -> vector<6x256xf32>
    %117 = arith.addf %111, %116 : vector<6x256xf32>
    %c0_150 = arith.constant 0 : index
    %c3_151 = arith.constant 3 : index
    %c1_152 = arith.constant 1 : index
    %c0_153 = arith.constant 0 : index
    %118 = vector.load %arg1[%c0_150, %c3_151, %c1_152, %c0_153] : memref<1x4x7x28xf32, #tpu.memory_space<vmem>>, vector<1x1x6x28xf32>
    %119 = vector.shape_cast %118 : vector<1x1x6x28xf32> to vector<6x28xf32>
    %c4_154 = arith.constant 4 : index
    %c0_155 = arith.constant 0 : index
    %c0_156 = arith.constant 0 : index
    %120 = vector.load %arg2[%c4_154, %c0_155, %c0_156] : memref<5x28x256xf32, #tpu.memory_space<vmem>>, vector<1x28x256xf32>
    %121 = vector.shape_cast %120 : vector<1x28x256xf32> to vector<28x256xf32>
    %cst_157 = arith.constant dense<0.000000e+00> : vector<6x256xf32>
    %122 = tpu.matmul %119, %121, %cst_157 {dimension_numbers = #tpu.dot_dimension_numbers<[1], [0], [0], [1], [0, 0, 1, 1], [], []>} : vector<6x28xf32>, vector<28x256xf32>, vector<6x256xf32> -> vector<6x256xf32>
    %123 = arith.addf %117, %122 : vector<6x256xf32>
    %124 = arith.maximumf %30, %61 : vector<6x256xf32>
    %125 = vector.extract_strided_slice %124 {offsets = [0, 0], sizes = [6, 128], strides = [1, 1]} : vector<6x256xf32> to vector<6x128xf32>
    %126 = vector.extract_strided_slice %124 {offsets = [0, 128], sizes = [6, 128], strides = [1, 1]} : vector<6x256xf32> to vector<6x128xf32>
    %127 = arith.maximumf %125, %126 : vector<6x128xf32>
    %c0_158 = arith.constant 0 : index
    %c0_159 = arith.constant 0 : index
    %128 = vector.load %arg3[%c0_158, %c0_159] : memref<1x128xf32, #tpu.memory_space<vmem>>, vector<1x128xf32>
    %129 = vector.broadcast %128 : vector<1x128xf32> to vector<6x128xf32>
    %130 = arith.addf %127, %129 : vector<6x128xf32>
    %cst_160 = arith.constant 0.000000e+00 : f32
    %131 = vector.broadcast %cst_160 : f32 to vector<6x128xf32>
    %132 = arith.maximumf %130, %131 : vector<6x128xf32>
    %133 = arith.maximumf %92, %123 : vector<6x256xf32>
    %134 = vector.extract_strided_slice %133 {offsets = [0, 0], sizes = [6, 128], strides = [1, 1]} : vector<6x256xf32> to vector<6x128xf32>
    %135 = vector.extract_strided_slice %133 {offsets = [0, 128], sizes = [6, 128], strides = [1, 1]} : vector<6x256xf32> to vector<6x128xf32>
    %136 = arith.maximumf %134, %135 : vector<6x128xf32>
    %c0_161 = arith.constant 0 : index
    %c0_162 = arith.constant 0 : index
    %137 = vector.load %arg3[%c0_161, %c0_162] : memref<1x128xf32, #tpu.memory_space<vmem>>, vector<1x128xf32>
    %138 = vector.broadcast %137 : vector<1x128xf32> to vector<6x128xf32>
    %139 = arith.addf %136, %138 : vector<6x128xf32>
    %cst_163 = arith.constant 0.000000e+00 : f32
    %140 = vector.broadcast %cst_163 : f32 to vector<6x128xf32>
    %141 = arith.maximumf %139, %140 : vector<6x128xf32>
    %cst_164 = arith.constant 0.000000e+00 : f32
    %142 = vector.broadcast %cst_164 : f32 to vector<4x256xf32>
    %143 = vector.extract_strided_slice %132 {offsets = [0, 0], sizes = [4, 128], strides = [1, 1]} : vector<6x128xf32> to vector<4x128xf32>
    %c0_165 = arith.constant 0 : index
    %c0_166 = arith.constant 0 : index
    %c0_167 = arith.constant 0 : index
    %144 = vector.load %arg4[%c0_165, %c0_166, %c0_167] : memref<5x128x256xf32, #tpu.memory_space<vmem>>, vector<1x128x256xf32>
    %145 = vector.shape_cast %144 : vector<1x128x256xf32> to vector<128x256xf32>
    %cst_168 = arith.constant dense<0.000000e+00> : vector<4x256xf32>
    %146 = tpu.matmul %143, %145, %cst_168 {dimension_numbers = #tpu.dot_dimension_numbers<[1], [0], [0], [1], [0, 0, 1, 1], [], []>} : vector<4x128xf32>, vector<128x256xf32>, vector<4x256xf32> -> vector<4x256xf32>
    %147 = arith.addf %142, %146 : vector<4x256xf32>
    %148 = vector.extract_strided_slice %141 {offsets = [0, 0], sizes = [4, 128], strides = [1, 1]} : vector<6x128xf32> to vector<4x128xf32>
    %c1_169 = arith.constant 1 : index
    %c0_170 = arith.constant 0 : index
    %c0_171 = arith.constant 0 : index
    %149 = vector.load %arg4[%c1_169, %c0_170, %c0_171] : memref<5x128x256xf32, #tpu.memory_space<vmem>>, vector<1x128x256xf32>
    %150 = vector.shape_cast %149 : vector<1x128x256xf32> to vector<128x256xf32>
    %cst_172 = arith.constant dense<0.000000e+00> : vector<4x256xf32>
    %151 = tpu.matmul %148, %150, %cst_172 {dimension_numbers = #tpu.dot_dimension_numbers<[1], [0], [0], [1], [0, 0, 1, 1], [], []>} : vector<4x128xf32>, vector<128x256xf32>, vector<4x256xf32> -> vector<4x256xf32>
    %152 = arith.addf %147, %151 : vector<4x256xf32>
    %153 = vector.extract_strided_slice %132 {offsets = [1, 0], sizes = [4, 128], strides = [1, 1]} : vector<6x128xf32> to vector<4x128xf32>
    %c2_173 = arith.constant 2 : index
    %c0_174 = arith.constant 0 : index
    %c0_175 = arith.constant 0 : index
    %154 = vector.load %arg4[%c2_173, %c0_174, %c0_175] : memref<5x128x256xf32, #tpu.memory_space<vmem>>, vector<1x128x256xf32>
    %155 = vector.shape_cast %154 : vector<1x128x256xf32> to vector<128x256xf32>
    %cst_176 = arith.constant dense<0.000000e+00> : vector<4x256xf32>
    %156 = tpu.matmul %153, %155, %cst_176 {dimension_numbers = #tpu.dot_dimension_numbers<[1], [0], [0], [1], [0, 0, 1, 1], [], []>} : vector<4x128xf32>, vector<128x256xf32>, vector<4x256xf32> -> vector<4x256xf32>
    %157 = arith.addf %152, %156 : vector<4x256xf32>
    %158 = vector.extract_strided_slice %141 {offsets = [1, 0], sizes = [4, 128], strides = [1, 1]} : vector<6x128xf32> to vector<4x128xf32>
    %c3_177 = arith.constant 3 : index
    %c0_178 = arith.constant 0 : index
    %c0_179 = arith.constant 0 : index
    %159 = vector.load %arg4[%c3_177, %c0_178, %c0_179] : memref<5x128x256xf32, #tpu.memory_space<vmem>>, vector<1x128x256xf32>
    %160 = vector.shape_cast %159 : vector<1x128x256xf32> to vector<128x256xf32>
    %cst_180 = arith.constant dense<0.000000e+00> : vector<4x256xf32>
    %161 = tpu.matmul %158, %160, %cst_180 {dimension_numbers = #tpu.dot_dimension_numbers<[1], [0], [0], [1], [0, 0, 1, 1], [], []>} : vector<4x128xf32>, vector<128x256xf32>, vector<4x256xf32> -> vector<4x256xf32>
    %162 = arith.addf %157, %161 : vector<4x256xf32>
    %163 = vector.extract_strided_slice %132 {offsets = [2, 0], sizes = [4, 128], strides = [1, 1]} : vector<6x128xf32> to vector<4x128xf32>
    %c4_181 = arith.constant 4 : index
    %c0_182 = arith.constant 0 : index
    %c0_183 = arith.constant 0 : index
    %164 = vector.load %arg4[%c4_181, %c0_182, %c0_183] : memref<5x128x256xf32, #tpu.memory_space<vmem>>, vector<1x128x256xf32>
    %165 = vector.shape_cast %164 : vector<1x128x256xf32> to vector<128x256xf32>
    %cst_184 = arith.constant dense<0.000000e+00> : vector<4x256xf32>
    %166 = tpu.matmul %163, %165, %cst_184 {dimension_numbers = #tpu.dot_dimension_numbers<[1], [0], [0], [1], [0, 0, 1, 1], [], []>} : vector<4x128xf32>, vector<128x256xf32>, vector<4x256xf32> -> vector<4x256xf32>
    %167 = arith.addf %162, %166 : vector<4x256xf32>
    %cst_185 = arith.constant 0.000000e+00 : f32
    %168 = vector.broadcast %cst_185 : f32 to vector<4x256xf32>
    %169 = vector.extract_strided_slice %141 {offsets = [0, 0], sizes = [4, 128], strides = [1, 1]} : vector<6x128xf32> to vector<4x128xf32>
    %c0_186 = arith.constant 0 : index
    %c0_187 = arith.constant 0 : index
    %c0_188 = arith.constant 0 : index
    %170 = vector.load %arg4[%c0_186, %c0_187, %c0_188] : memref<5x128x256xf32, #tpu.memory_space<vmem>>, vector<1x128x256xf32>
    %171 = vector.shape_cast %170 : vector<1x128x256xf32> to vector<128x256xf32>
    %cst_189 = arith.constant dense<0.000000e+00> : vector<4x256xf32>
    %172 = tpu.matmul %169, %171, %cst_189 {dimension_numbers = #tpu.dot_dimension_numbers<[1], [0], [0], [1], [0, 0, 1, 1], [], []>} : vector<4x128xf32>, vector<128x256xf32>, vector<4x256xf32> -> vector<4x256xf32>
    %173 = arith.addf %168, %172 : vector<4x256xf32>
    %174 = vector.extract_strided_slice %132 {offsets = [1, 0], sizes = [4, 128], strides = [1, 1]} : vector<6x128xf32> to vector<4x128xf32>
    %c1_190 = arith.constant 1 : index
    %c0_191 = arith.constant 0 : index
    %c0_192 = arith.constant 0 : index
    %175 = vector.load %arg4[%c1_190, %c0_191, %c0_192] : memref<5x128x256xf32, #tpu.memory_space<vmem>>, vector<1x128x256xf32>
    %176 = vector.shape_cast %175 : vector<1x128x256xf32> to vector<128x256xf32>
    %cst_193 = arith.constant dense<0.000000e+00> : vector<4x256xf32>
    %177 = tpu.matmul %174, %176, %cst_193 {dimension_numbers = #tpu.dot_dimension_numbers<[1], [0], [0], [1], [0, 0, 1, 1], [], []>} : vector<4x128xf32>, vector<128x256xf32>, vector<4x256xf32> -> vector<4x256xf32>
    %178 = arith.addf %173, %177 : vector<4x256xf32>
    %179 = vector.extract_strided_slice %141 {offsets = [1, 0], sizes = [4, 128], strides = [1, 1]} : vector<6x128xf32> to vector<4x128xf32>
    %c2_194 = arith.constant 2 : index
    %c0_195 = arith.constant 0 : index
    %c0_196 = arith.constant 0 : index
    %180 = vector.load %arg4[%c2_194, %c0_195, %c0_196] : memref<5x128x256xf32, #tpu.memory_space<vmem>>, vector<1x128x256xf32>
    %181 = vector.shape_cast %180 : vector<1x128x256xf32> to vector<128x256xf32>
    %cst_197 = arith.constant dense<0.000000e+00> : vector<4x256xf32>
    %182 = tpu.matmul %179, %181, %cst_197 {dimension_numbers = #tpu.dot_dimension_numbers<[1], [0], [0], [1], [0, 0, 1, 1], [], []>} : vector<4x128xf32>, vector<128x256xf32>, vector<4x256xf32> -> vector<4x256xf32>
    %183 = arith.addf %178, %182 : vector<4x256xf32>
    %184 = vector.extract_strided_slice %132 {offsets = [2, 0], sizes = [4, 128], strides = [1, 1]} : vector<6x128xf32> to vector<4x128xf32>
    %c3_198 = arith.constant 3 : index
    %c0_199 = arith.constant 0 : index
    %c0_200 = arith.constant 0 : index
    %185 = vector.load %arg4[%c3_198, %c0_199, %c0_200] : memref<5x128x256xf32, #tpu.memory_space<vmem>>, vector<1x128x256xf32>
    %186 = vector.shape_cast %185 : vector<1x128x256xf32> to vector<128x256xf32>
    %cst_201 = arith.constant dense<0.000000e+00> : vector<4x256xf32>
    %187 = tpu.matmul %184, %186, %cst_201 {dimension_numbers = #tpu.dot_dimension_numbers<[1], [0], [0], [1], [0, 0, 1, 1], [], []>} : vector<4x128xf32>, vector<128x256xf32>, vector<4x256xf32> -> vector<4x256xf32>
    %188 = arith.addf %183, %187 : vector<4x256xf32>
    %189 = vector.extract_strided_slice %141 {offsets = [2, 0], sizes = [4, 128], strides = [1, 1]} : vector<6x128xf32> to vector<4x128xf32>
    %c4_202 = arith.constant 4 : index
    %c0_203 = arith.constant 0 : index
    %c0_204 = arith.constant 0 : index
    %190 = vector.load %arg4[%c4_202, %c0_203, %c0_204] : memref<5x128x256xf32, #tpu.memory_space<vmem>>, vector<1x128x256xf32>
    %191 = vector.shape_cast %190 : vector<1x128x256xf32> to vector<128x256xf32>
    %cst_205 = arith.constant dense<0.000000e+00> : vector<4x256xf32>
    %192 = tpu.matmul %189, %191, %cst_205 {dimension_numbers = #tpu.dot_dimension_numbers<[1], [0], [0], [1], [0, 0, 1, 1], [], []>} : vector<4x128xf32>, vector<128x256xf32>, vector<4x256xf32> -> vector<4x256xf32>
    %193 = arith.addf %188, %192 : vector<4x256xf32>
    %194 = arith.maximumf %167, %193 : vector<4x256xf32>
    %195 = vector.extract_strided_slice %194 {offsets = [0, 0], sizes = [4, 128], strides = [1, 1]} : vector<4x256xf32> to vector<4x128xf32>
    %196 = vector.extract_strided_slice %194 {offsets = [0, 128], sizes = [4, 128], strides = [1, 1]} : vector<4x256xf32> to vector<4x128xf32>
    %197 = arith.maximumf %195, %196 : vector<4x128xf32>
    %c0_206 = arith.constant 0 : index
    %c0_207 = arith.constant 0 : index
    %198 = vector.load %arg5[%c0_206, %c0_207] : memref<1x128xf32, #tpu.memory_space<vmem>>, vector<1x128xf32>
    %199 = vector.broadcast %198 : vector<1x128xf32> to vector<4x128xf32>
    %200 = arith.addf %197, %199 : vector<4x128xf32>
    %cst_208 = arith.constant 0.000000e+00 : f32
    %201 = vector.broadcast %cst_208 : f32 to vector<4x128xf32>
    %202 = arith.maximumf %200, %201 : vector<4x128xf32>
    %c0_209 = arith.constant 0 : index
    %c0_210 = arith.constant 0 : index
    %203 = vector.load %arg7[%c0_209, %c0_210] : memref<1x120xf32, #tpu.memory_space<vmem>>, vector<1x120xf32>
    %204 = vector.extract_strided_slice %202 {offsets = [0, 0], sizes = [1, 128], strides = [1, 1]} : vector<4x128xf32> to vector<1x128xf32>
    %c0_211 = arith.constant 0 : index
    %c0_212 = arith.constant 0 : index
    %c0_213 = arith.constant 0 : index
    %205 = vector.load %arg6[%c0_211, %c0_212, %c0_213] : memref<4x128x120xf32, #tpu.memory_space<vmem>>, vector<1x128x120xf32>
    %206 = vector.shape_cast %205 : vector<1x128x120xf32> to vector<128x120xf32>
    %cst_214 = arith.constant dense<0.000000e+00> : vector<1x120xf32>
    %207 = tpu.matmul %204, %206, %cst_214 {dimension_numbers = #tpu.dot_dimension_numbers<[1], [0], [0], [1], [0, 0, 1, 1], [], []>} : vector<1x128xf32>, vector<128x120xf32>, vector<1x120xf32> -> vector<1x120xf32>
    %208 = arith.addf %203, %207 : vector<1x120xf32>
    %209 = vector.extract_strided_slice %202 {offsets = [1, 0], sizes = [1, 128], strides = [1, 1]} : vector<4x128xf32> to vector<1x128xf32>
    %c1_215 = arith.constant 1 : index
    %c0_216 = arith.constant 0 : index
    %c0_217 = arith.constant 0 : index
    %210 = vector.load %arg6[%c1_215, %c0_216, %c0_217] : memref<4x128x120xf32, #tpu.memory_space<vmem>>, vector<1x128x120xf32>
    %211 = vector.shape_cast %210 : vector<1x128x120xf32> to vector<128x120xf32>
    %cst_218 = arith.constant dense<0.000000e+00> : vector<1x120xf32>
    %212 = tpu.matmul %209, %211, %cst_218 {dimension_numbers = #tpu.dot_dimension_numbers<[1], [0], [0], [1], [0, 0, 1, 1], [], []>} : vector<1x128xf32>, vector<128x120xf32>, vector<1x120xf32> -> vector<1x120xf32>
    %213 = arith.addf %208, %212 : vector<1x120xf32>
    %214 = vector.extract_strided_slice %202 {offsets = [2, 0], sizes = [1, 128], strides = [1, 1]} : vector<4x128xf32> to vector<1x128xf32>
    %c2_219 = arith.constant 2 : index
    %c0_220 = arith.constant 0 : index
    %c0_221 = arith.constant 0 : index
    %215 = vector.load %arg6[%c2_219, %c0_220, %c0_221] : memref<4x128x120xf32, #tpu.memory_space<vmem>>, vector<1x128x120xf32>
    %216 = vector.shape_cast %215 : vector<1x128x120xf32> to vector<128x120xf32>
    %cst_222 = arith.constant dense<0.000000e+00> : vector<1x120xf32>
    %217 = tpu.matmul %214, %216, %cst_222 {dimension_numbers = #tpu.dot_dimension_numbers<[1], [0], [0], [1], [0, 0, 1, 1], [], []>} : vector<1x128xf32>, vector<128x120xf32>, vector<1x120xf32> -> vector<1x120xf32>
    %218 = arith.addf %213, %217 : vector<1x120xf32>
    %219 = vector.extract_strided_slice %202 {offsets = [3, 0], sizes = [1, 128], strides = [1, 1]} : vector<4x128xf32> to vector<1x128xf32>
    %c3_223 = arith.constant 3 : index
    %c0_224 = arith.constant 0 : index
    %c0_225 = arith.constant 0 : index
    %220 = vector.load %arg6[%c3_223, %c0_224, %c0_225] : memref<4x128x120xf32, #tpu.memory_space<vmem>>, vector<1x128x120xf32>
    %221 = vector.shape_cast %220 : vector<1x128x120xf32> to vector<128x120xf32>
    %cst_226 = arith.constant dense<0.000000e+00> : vector<1x120xf32>
    %222 = tpu.matmul %219, %221, %cst_226 {dimension_numbers = #tpu.dot_dimension_numbers<[1], [0], [0], [1], [0, 0, 1, 1], [], []>} : vector<1x128xf32>, vector<128x120xf32>, vector<1x120xf32> -> vector<1x120xf32>
    %223 = arith.addf %218, %222 : vector<1x120xf32>
    %cst_227 = arith.constant 0.000000e+00 : f32
    %224 = vector.broadcast %cst_227 : f32 to vector<1x120xf32>
    %225 = arith.maximumf %223, %224 : vector<1x120xf32>
    %c0_228 = arith.constant 0 : index
    %c0_229 = arith.constant 0 : index
    %226 = vector.load %arg8[%c0_228, %c0_229] : memref<120x84xf32, #tpu.memory_space<vmem>>, vector<120x84xf32>
    %cst_230 = arith.constant dense<0.000000e+00> : vector<1x84xf32>
    %227 = tpu.matmul %225, %226, %cst_230 {dimension_numbers = #tpu.dot_dimension_numbers<[1], [0], [0], [1], [0, 0, 1, 1], [], []>} : vector<1x120xf32>, vector<120x84xf32>, vector<1x84xf32> -> vector<1x84xf32>
    %c0_231 = arith.constant 0 : index
    %c0_232 = arith.constant 0 : index
    %228 = vector.load %arg9[%c0_231, %c0_232] : memref<1x84xf32, #tpu.memory_space<vmem>>, vector<1x84xf32>
    %229 = arith.addf %227, %228 : vector<1x84xf32>
    %cst_233 = arith.constant 0.000000e+00 : f32
    %230 = vector.broadcast %cst_233 : f32 to vector<1x84xf32>
    %231 = arith.maximumf %229, %230 : vector<1x84xf32>
    %c0_234 = arith.constant 0 : index
    %c0_235 = arith.constant 0 : index
    %232 = vector.load %arg10[%c0_234, %c0_235] : memref<84x10xf32, #tpu.memory_space<vmem>>, vector<84x10xf32>
    %cst_236 = arith.constant dense<0.000000e+00> : vector<1x10xf32>
    %233 = tpu.matmul %231, %232, %cst_236 {dimension_numbers = #tpu.dot_dimension_numbers<[1], [0], [0], [1], [0, 0, 1, 1], [], []>} : vector<1x84xf32>, vector<84x10xf32>, vector<1x10xf32> -> vector<1x10xf32>
    %c0_237 = arith.constant 0 : index
    %c0_238 = arith.constant 0 : index
    %234 = vector.load %arg11[%c0_237, %c0_238] : memref<1x10xf32, #tpu.memory_space<vmem>>, vector<1x10xf32>
    %235 = arith.addf %233, %234 : vector<1x10xf32>
    %c0_239 = arith.constant 0 : index
    %c0_240 = arith.constant 0 : index
    %c0_241 = arith.constant 0 : index
    %236 = vector.load %arg12[%c0_239, %c0_240, %c0_241] : memref<1x1x10xf32, #tpu.memory_space<vmem>>, vector<1x1x10xf32>
    %237 = vector.shape_cast %236 : vector<1x1x10xf32> to vector<1x10xf32>
    %238 = vector.shape_cast %235 : vector<1x10xf32> to vector<1x1x10xf32>
    tpu.vector_store %arg12[%c0_239, %c0_240, %c0_241], %238 {strides = array<i32>} : memref<1x1x10xf32, #tpu.memory_space<vmem>>, vector<1x1x10xf32>,
    return
  }
  func.func @transform_0(%arg0: i32) -> (i32, i32, i32, i32) {
    %c0_i32 = arith.constant 0 : i32
    %c0_i32_0 = arith.constant 0 : i32
    %c0_i32_1 = arith.constant 0 : i32
    %c0_i32_2 = arith.constant 0 : i32
    return %arg0, %c0_i32, %c0_i32_0, %c0_i32_1 : i32, i32, i32, i32
  }
  func.func @transform_1(%arg0: i32) -> (i32, i32, i32) {
    %c0_i32 = arith.constant 0 : i32
    %c0_i32_0 = arith.constant 0 : i32
    %c0_i32_1 = arith.constant 0 : i32
    %c0_i32_2 = arith.constant 0 : i32
    return %c0_i32, %c0_i32_0, %c0_i32_1 : i32, i32, i32
  }
  func.func @transform_2(%arg0: i32) -> (i32, i32) {
    %c0_i32 = arith.constant 0 : i32
    %c0_i32_0 = arith.constant 0 : i32
    %c0_i32_1 = arith.constant 0 : i32
    return %c0_i32, %c0_i32_0 : i32, i32
  }
  func.func @transform_3(%arg0: i32) -> (i32, i32, i32) {
    %c0_i32 = arith.constant 0 : i32
    %c0_i32_0 = arith.constant 0 : i32
    %c0_i32_1 = arith.constant 0 : i32
    %c0_i32_2 = arith.constant 0 : i32
    return %c0_i32, %c0_i32_0, %c0_i32_1 : i32, i32, i32
  }
  func.func @transform_4(%arg0: i32) -> (i32, i32) {
    %c0_i32 = arith.constant 0 : i32
    %c0_i32_0 = arith.constant 0 : i32
    %c0_i32_1 = arith.constant 0 : i32
    return %c0_i32, %c0_i32_0 : i32, i32
  }
  func.func @transform_5(%arg0: i32) -> (i32, i32, i32) {
    %c0_i32 = arith.constant 0 : i32
    %c0_i32_0 = arith.constant 0 : i32
    %c0_i32_1 = arith.constant 0 : i32
    %c0_i32_2 = arith.constant 0 : i32
    return %c0_i32, %c0_i32_0, %c0_i32_1 : i32, i32, i32
  }
  func.func @transform_6(%arg0: i32) -> (i32, i32) {
    %c0_i32 = arith.constant 0 : i32
    %c0_i32_0 = arith.constant 0 : i32
    %c0_i32_1 = arith.constant 0 : i32
    return %c0_i32, %c0_i32_0 : i32, i32
  }
  func.func @transform_7(%arg0: i32) -> (i32, i32) {
    %c0_i32 = arith.constant 0 : i32
    %c0_i32_0 = arith.constant 0 : i32
    %c0_i32_1 = arith.constant 0 : i32
    return %c0_i32, %c0_i32_0 : i32, i32
  }
  func.func @transform_8(%arg0: i32) -> (i32, i32) {
    %c0_i32 = arith.constant 0 : i32
    %c0_i32_0 = arith.constant 0 : i32
    %c0_i32_1 = arith.constant 0 : i32
    return %c0_i32, %c0_i32_0 : i32, i32
  }
  func.func @transform_9(%arg0: i32) -> (i32, i32) {
    %c0_i32 = arith.constant 0 : i32
    %c0_i32_0 = arith.constant 0 : i32
    %c0_i32_1 = arith.constant 0 : i32
    return %c0_i32, %c0_i32_0 : i32, i32
  }
  func.func @transform_10(%arg0: i32) -> (i32, i32) {
    %c0_i32 = arith.constant 0 : i32
    %c0_i32_0 = arith.constant 0 : i32
    %c0_i32_1 = arith.constant 0 : i32
    return %c0_i32, %c0_i32_0 : i32, i32
  }
  func.func @transform_11(%arg0: i32) -> (i32, i32, i32) {
    %c0_i32 = arith.constant 0 : i32
    %c0_i32_0 = arith.constant 0 : i32
    %c0_i32_1 = arith.constant 0 : i32
    return %arg0, %c0_i32, %c0_i32_0 : i32, i32, i32
  }
}

</mosaic_0001>

<bundles_post_ra>
// kernel: net_forward.1
= control target key start
LH: loop header
LB: loop body
LE: loop exit
PB: predicated region body
PF: predicated region fallthrough
CT: control target
= control target key end

     0   :  { %16 = vsyncpa [#allocation3], 0  ;;  %s6564_s0 = inlined_call_operand.vmem [shape: f32[2,4,7,28], index: 0, kind: input, shape index: {}]   ;;  %s6565_s1 = inlined_call_operand.hbm [shape: f32[5,28,256], index: 1, kind: input, shape index: {}]   ;;  %s6566_s2 = inlined_call_operand.vmem [shape: f32[1,128], index: 2, kind: input, shape index: {}]   ;;  %s6567_s3 = inlined_call_operand.vmem [shape: f32[5,128,256], index: 3, kind: input, shape index: {}]   ;;  %s6568_s4 = inlined_call_operand.vmem [shape: f32[1,128], index: 4, kind: input, shape index: {}]   ;;  %s6569_s5 = inlined_call_operand.vmem [shape: f32[4,128,120], index: 5, kind: input, shape index: {}]   ;;  %s6570_s6 = inlined_call_operand.vmem [shape: f32[1,120], index: 6, kind: input, shape index: {}]   ;;  %s6571_s7 = inlined_call_operand.vmem [shape: f32[120,84], index: 7, kind: input, shape index: {}]   ;;  %s6572_s8 = inlined_call_operand.vmem [shape: f32[1,84], index: 8, kind: input, shape index: {}]   ;;  %s6573_s9 = inlined_call_operand.vmem [shape: f32[84,10], index: 9, kind: input, shape index: {}]   ;;  %s6574_s10 = inlined_call_operand.vmem [shape: f32[1,10], index: 10, kind: input, shape index: {}]   ;;  %s6575_s11 = inlined_call_operand.hbm [shape: f32[2,1,10], index: 11, kind: output, shape index: {}]  }
   0x1   :  { %17 = vsyncpa [#allocation4], 0 }
   0x2   :  { %19 = vsyncpa [#allocation4 + $0x1], 0  ;;  %s4981_s17 = smov 0   ;;  %s4983_s18 = smov 0  }
   0x3   :  { %s4985_s19 = smov 0   ;;  %s4987_s20 = smov 0  }
   0x4 LB: > { %s5002_s21 = sadd.s32 4294967295, %s4911_s20   ;;  %s3501_s22 = sadd.s32 4294967294, %s4911_s20   ;;  %s4911_s20 = sphi %s4987_s20, %s6606_s20   ;;  %s4907_s19 = sphi %s4985_s19, %s6605_s19   ;;  %s4903_s18 = sphi %s4983_s18, %s6604_s18   ;;  %s4899_s17 = sphi %s4981_s17, %s6603_s17  }
   0x5   : > { %s5006_s23 = sadd.s32 1, %s4911_s20   ;;  %s268_s24 = sadd.s32 1, %s4907_s19 }
   0x6   : > { %s265_s25 = ssub.s32 %s4911_s20, %s5006_s23  ;;  %p278_p0 = scmp.ne.s32.totalorder %s4907_s19, %s4903_s18 }
   0x7   : > { %p266_p1 = scmp.eq.s32.totalorder %s265_s25, 0  ;;  %p279_p2 = scmp.eq.s32.totalorder %s5002_s21, 1 }
   0x8   : > { %p284_p3 = scmp.ne.s32.totalorder %s4903_s18, %s4899_s17  ;;  %p285_p4 = scmp.eq.s32.totalorder %s3501_s22, 1 }
   0x9   : > { %s5017_s26 = scalar_select %p266_p1, %s4907_s19, %s268_s24  }
   0xa   : > { %p5019_p5 = por %p279_p2, %p278_p0  ;;  %p5023_p6 = por %p285_p4, %p284_p3 }
   0xb   : > { %6584 = sst [smem:[#allocation8_spill]] %s5017_s26  ;;  %p3502_p7 = scmp.ge.s32.totalorder %s4911_s20, 1 }
   0xc   : > { %s6585_s27 = scalar_select %p5019_p5, 1, 0 }
   0xd   : > { %s6586_s28 = scalar_select %p5023_p6, 1, 0 }
   0xe   : > { %p292_p8 = scmp.lt.s32.totalorder %s4911_s20, 3  ;;  %p6576_p9 = scmp.eq.s32.totalorder %s5002_s21, 0 }
   0xf   : > { %s4913_s30 = smov [#allocation2]   ;;  %s4817_s16 = scalar_lea.hbm %s6565_s1, 5120 }
  0x10   : > { %p5030_p10 = pnand %p3502_p7, %p292_p8  ;;  %s304_s12 = sshll.u32 %s4913_s30, 4  ;;  %s305_s12 = int_to_ptr.vmem [resolvable:$true] %s304_s12 }
  0x11   : > { %p4818_p13 = scmp.ne.s32.totalorder %s6565_s1, %s4817_s16  ;;  %p4824_p3 = scmp.lt.u32.totalorder %s4817_s16, %s6565_s1 }
  0x12   : > { %s6587_s29 = scalar_select %p5030_p10, 1, 0 }
  0x13   : > { %p4767_p11 = pneg %p5030_p10 }
  0x15   : > { %p5038_p12 = pnand %p6576_p9, %p4767_p11 }
  0x17   : > { %p4819_p0 = pneg %p5038_p12 }
  0x19   : > { %p4820_p1 = pnand %p4819_p0, %p4818_p13 }
  0x1b   : > { %p4821_p2 = pneg %p4820_p1 }
  0x1d   : > { %p4826_p4 = pnand %p4824_p3, %p4821_p2 }
  0x1f   : > { %4829 = shalt.err (!%p4826_p4)
}
  0x20   : > { %s4830_s26 = scalar_lea.vmem %s305_s12, 5120  ;;  %p4838_p9 = scmp.lt.s32.totalorder %s305_s12, %s305_s12 }
  0x21   : > { %p4831_p7 = scmp.ne.s32.totalorder %s305_s12, %s4830_s26  ;;  %p4839_p6 = scmp.lt.s32.totalorder %s4830_s26, %s4830_s26 }
  0x23   : > { %p4833_p8 = pnand %p4831_p7, %p4819_p0  ;;  %p4840_p5 = por %p4839_p6, %p4838_p9 }
  0x25   : > { %p4834_p11 = pneg %p4833_p8 }
  0x27   : > { %p4841_p10 = pnand %p4840_p5, %p4834_p11 }
  0x29   : > { %4844 = shalt.err (!%p4841_p10)
}
  0x2a   : > { %s4914_s14 = smov 256   ;;  %s4915_s15 = smov 16  }
  0x2b   : > { %4770 = dma.hbm_to_vmem [thread:$0]  (!%p5038_p12), %s6565_s1, 5120, %s305_s12, [#allocation3], %s4914_s14, %s4914_s14, %s4915_s15  }
  0x2c   : > { %p6589_p13 = scmp.ne.s32.totalorder %s6587_s29, 0 }
  0x2e   : > { %355 = sbr.rel (%p6589_p13) target bundleno = 1506 (0x5e2), region = 64 }
  0x35   : > { %p6590_p1 = scmp.eq.s32.totalorder %s5002_s21, 0 }
  0x37   : > { %4890 = dma.done.wait (%p6590_p1), [#allocation3], 5120   ;;  %p6591_p0 = pmov %p6590_p1 }
  0x38   : > { %v6579_v0 = vmov 0.0   ;;  %p394_p5 = scmp.lt.s32.totalorder %s5002_s21, 1  ;;  %vm423_vm0 = vcmask 1043456   ;;  %vm4917_vm1 = vmmov 1   ;;  %v412_v2 = vld [vmem:[#allocation2 + $0x48] sm:$0xff]  ;;  %v414_v3 = vld [vmem:[#allocation2 + $0x58] sm:$0xff] }
  0x39   : > { %4892 = vsyncadd (%p6591_p0), [#allocation3], 4294962176  ;;  %494 = vmatprep.mubr.f32.mxu1 %v6579_v0  ;;  %574 = vmatprep.mubr.f32.mxu0 %v6579_v0  ;;  %v401_v4 = vld [vmem:[#allocation2 + $0x8] sm:$0xff]  ;;  %v5075_v5 = vpack.c.bf16 %v414_v3, %v412_v2  ;;  %v403_v6 = vld [vmem:[#allocation2 + $0x18] sm:$0xff]  ;;  %vm419_vm3 = vcmask 228352   ;;  %vm4919_vm4 = vmmov 0  }
  0x3a   : > { %s5068_s26 = scalar_select %p394_p5, %s5002_s21, 1  ;;  %vm5071_vm2 = vmpackc.low %vm423_vm0, %vm4917_vm1  ;;  %v411_v7 = vld [vmem:[#allocation2 + $0x40] sm:$0xff]  ;;  %v413_v8 = vld [vmem:[#allocation2 + $0x50] sm:$0xff]  ;;  %v5077_v9 = vpack.c.bf16 %v403_v6, %v401_v4  ;;  %vm3255_vm5 = vcmask 982016   ;;  %vm3342_vm6 = vcmask 687104   ;;  %vm3419_vm7 = vcmask 73728  }
  0x3b   : > { %v5079_v10 = vpack.c.bf16 %v413_v8, %v411_v7  ;;  %v400_v11 = vld [vmem:[#allocation2] sm:$0xff]  ;;  %v402_v12 = vld [vmem:[#allocation2 + $0x10] sm:$0xff]  ;;  %v416_v13 = vld [vmem:[#allocation2 + $0x68] sm:$0xff]  ;;  %4055 = vmatprep.subr.bf16.mxu1 %v5075_v5  ;;  %s392_s14 = sand.u32 1, %s4903_s18   ;;  %s3756_s24 = sshll.u32 %s5002_s21, 4 }
  0x3c   : > { %s3759_s29 = sshll.u32 %s5068_s26, 5  ;;  %v5083_v14 = vpack.c.bf16 %v402_v12, %v400_v11  ;;  %v418_v15 = vld [vmem:[#allocation2 + $0x78] sm:$0xf]  ;;  %v405_v16 = vld [vmem:[#allocation2 + $0x28] sm:$0xff]  ;;  %4065 = vmatprep.subr.bf16.mxu0 %v5077_v9  ;;  %v415_v20 = vld [vmem:[#allocation2 + $0x60] sm:$0xff]  ;;  %s393_s26 = scalar_lea.vmem [#allocation5], %s392_s14 }
  0x3d   : > { %v407_v17 = vld [vmem:[#allocation2 + $0x38] sm:$0xf]  ;;  %4057 = vmatpush1.bf16.msra.mxu1 %v5079_v10  ;;  %v5087_v18 = vpack.c.bf16 %v418_v15, %v416_v13  ;;  %v417_v21 = vld [vmem:[#allocation2 + $0x70] sm:$0xf]  ;;  %v404_v22 = vld [vmem:[#allocation2 + $0x20] sm:$0xff]  ;;  %s5097_s16 = scalar_lea.vmem %s6564_s0, %s3759_s29  ;;  %s3434_s29 = sshll.u32 %s393_s26, 4  ;;  %s6524_s29 = int_to_ptr.vmem [resolvable:$true] %s3434_s29 }
  0x3e   : > { %v5089_v19 = vpack.c.bf16 %v407_v17, %v405_v16  ;;  %4067 = vmatpush1.bf16.msra.mxu0 %v5083_v14  ;;  %v5092_v23 = vpack.c.bf16 %v417_v21, %v415_v20  ;;  %v406_v24 = vld [vmem:[#allocation2 + $0x30] sm:$0xf]  ;;  %v585_v26 = vld [vmem:[#allocation2 + $0x88] sm:$0xff]  ;;  %v587_v27 = vld [vmem:[#allocation2 + $0x98] sm:$0xff]  ;;  %s3422_s25 = scalar_lea.sflag [#allocation4], %s392_s14  ;;  %s4845_s30 = scalar_lea.vmem %s6524_s29, 16 }
  0x3f   : > { %4060 = vmatprep.subr.msk.bf16.mxu1 %vm5071_vm2, %v5087_v18  ;;  %v5105_v25 = vpack.c.bf16 %v406_v24, %v404_v22  ;;  %v584_v28 = vld [vmem:[#allocation2 + $0x80] sm:$0xff]  ;;  %v5107_v29 = vpack.c.bf16 %v587_v27, %v585_v26  ;;  %v586_v30 = vld [vmem:[#allocation2 + $0x90] sm:$0xff]  ;;  %v589_v31 = vld [vmem:[#allocation2 + $0xa8] sm:$0xff]  ;;  %p4846_p6 = scmp.ne.s32.totalorder %s6524_s29, %s4845_s30  ;;  %p6600_p9 = scmp.ne.s32.totalorder %s6585_s27, 0 }
  0x40   : > { %4070 = vmatprep.subr.msk.bf16.mxu0 %vm5071_vm2, %v5089_v19  ;;  %v591_v32 = vld [vmem:[#allocation2 + $0xb8] sm:$0xf]  ;;  %v3509_v33 = vld [vmem:[%s5097_s16 + $0x8] sm:$0x3f]  ;;  %v399_v34 = vld [vmem:[%s5097_s16] sm:$0x3f]  ;;  %v5118_v35 = vpack.c.bf16 %v586_v30, %v584_v28 }
  0x41   : > { %4063 = vmatpush1.bf16.msk.msra.mxu1 %vm5071_vm2, %v5092_v23  ;;  %v5121_v36 = vpack.c.bf16 %v591_v32, %v589_v31  ;;  %v588_v37 = vld [vmem:[#allocation2 + $0xa0] sm:$0xff]  ;;  %v590_v38 = vld [vmem:[#allocation2 + $0xb0] sm:$0xf]  ;;  %v678_v39 = vld [vmem:[#allocation2 + $0xc8] sm:$0xff]  ;;  %p4847_p10 = pnand %p4846_p6, %p6600_p9  ;;  %s4920_s21 = smov [#allocation5]  }
  0x42   : > { %4073 = vmatpush1.bf16.msk.msra.mxu0 %vm5071_vm2, %v5105_v25  ;;  %4105 = vmatprep.subr.bf16.mxu1 %v5075_v5  ;;  %v680_v40 = vld [vmem:[#allocation2 + $0xd8] sm:$0xff]  ;;  %v5130_v41 = vpack.c.bf16 %v590_v38, %v588_v37  ;;  %v677_v43 = vld [vmem:[#allocation2 + $0xc0] sm:$0xff]  ;;  %v679_v44 = vld [vmem:[#allocation2 + $0xd0] sm:$0xff]  ;;  %s4849_s15 = sshll.u32 %s4920_s21, 4  ;;  %s4850_s15 = int_to_ptr.vmem [resolvable:$false] %s4849_s15 }
  0x43   : > { %4075 = vmatprep.subr.bf16.mxu0 %v5107_v29  ;;  %v5136_v42 = vpack.c.bf16 %v680_v40, %v678_v39  ;;  %v682_v45 = vld [vmem:[#allocation2 + $0xe8] sm:$0xff]  ;;  %v684_v46 = vld [vmem:[#allocation2 + $0xf8] sm:$0xf]  ;;  %v5143_v47 = vld [vmem:[%s5097_s16 + $0x10] sm:$0x3f]  ;;  %v5149_v48 = vpack.c.bf16 %v679_v44, %v677_v43  ;;  %p4848_p12 = pneg %p4847_p10  ;;  %s4851_s22 = scalar_lea.vmem %s4850_s15, 32 }
  0x44   : > { %3512 = vmatmul.mubr.msk.f32.vlgmr.msra.gmra.mrb[0].mxu1 %vm419_vm3, %v3509_v33  ;;  %v5152_v49 = vpack.c.bf16 %v684_v46, %v682_v45  ;;  %v681_v50 = vld [vmem:[#allocation2 + $0xe0] sm:$0xff]  ;;  %v683_v51 = vld [vmem:[#allocation2 + $0xf0] sm:$0xf]  ;;  %v770_v52 = vld [vmem:[#allocation2 + $0x108] sm:$0xff]  ;;  %p4852_p2 = scmp.lt.s32.totalorder %s6524_s29, %s4850_s15  ;;  %p4853_p3 = scmp.lt.s32.totalorder %s4851_s22, %s4845_s30 }
  0x45   : > { %3515 = vmatmul.mubr.msk.f32.vlgmr.msra.gmra.mrb[0].mxu0 %vm419_vm3, %v399_v34  ;;  %4107 = vmatpush1.bf16.msra.mxu1 %v5079_v10  ;;  %v772_v53 = vld [vmem:[#allocation2 + $0x118] sm:$0xff]  ;;  %v5163_v54 = vpack.c.bf16 %v683_v51, %v681_v50  ;;  %v769_v56 = vld [vmem:[#allocation2 + $0x100] sm:$0xff]  ;;  %v771_v57 = vld [vmem:[#allocation2 + $0x110] sm:$0xff] }
  0x46   : > { %4077 = vmatpush1.bf16.msra.mxu0 %v5118_v35  ;;  %4110 = vmatprep.subr.msk.bf16.mxu1 %vm5071_vm2, %v5087_v18  ;;  %v5169_v55 = vpack.c.bf16 %v772_v53, %v770_v52  ;;  %v774_v58 = vld [vmem:[#allocation2 + $0x128] sm:$0xff]  ;;  %v776_v59 = vld [vmem:[#allocation2 + $0x138] sm:$0xf]  ;;  %v5182_v61 = vpack.c.bf16 %v771_v57, %v769_v56  ;;  %v773_v63 = vld [vmem:[#allocation2 + $0x120] sm:$0xff]  ;;  %p4854_p4 = por %p4853_p3, %p4852_p2 }
  0x47   : > { %4080 = vmatprep.subr.msk.bf16.mxu0 %vm5071_vm2, %v5121_v36  ;;  %665 = vmatprep.mubr.f32.mxu0 %v6579_v0  ;;  %v5179_v60 = vld [vmem:[%s5097_s16 + $0x18] sm:$0x3f]  ;;  %v5185_v62 = vpack.c.bf16 %v776_v59, %v774_v58  ;;  %v775_v2 = vld [vmem:[#allocation2 + $0x130] sm:$0xf]  ;;  %v767_v4 = vld [vmem:[%s5097_s16 + $0x1] sm:$0x3f] }
  0x48   : > { %923 = vmatprep.mubr.f32.mxu1 %v6579_v0  ;;  %v5195_v3 = vpack.c.bf16 %v775_v2, %v773_v63  ;;  %v3539_v6 = vld [vmem:[%s5097_s16 + $0x9] sm:$0x3f]  ;;  %v3571_v7 = vld [vmem:[%s5097_s16 + $0x19] sm:$0x3f]  ;;  %v1973_v1 = vld [vmem:[%s6567_s3 + $0x10] sm:$0xff]  ;;  %p4855_p7 = pnand %p4854_p4, %p4848_p12 }
  0x49   : > { %4113 = vmatpush1.bf16.msk.msra.mxu1 %vm5071_vm2, %v5092_v23  ;;  %v1972_v8 = vld [vmem:[%s6567_s3 + $0x8] sm:$0xff]  ;;  %v1978_v13 = vld [vmem:[%s6567_s3 + $0x38] sm:$0xff]  ;;  %v1975_v16 = vld [vmem:[%s6567_s3 + $0x20] sm:$0xff] }
  0x4a   : > { %4083 = vmatpush1.bf16.msk.msra.mxu0 %vm5071_vm2, %v5130_v41  ;;  %4115 = vmatprep.subr.bf16.mxu1 %v5077_v9  ;;  %v1976_v12 = vld [vmem:[%s6567_s3 + $0x28] sm:$0xff]  ;;  %v1977_v17 = vld [vmem:[%s6567_s3 + $0x30] sm:$0xff]  ;;  %v1982_v20 = vld [vmem:[%s6567_s3 + $0x58] sm:$0xff] }
  0x4b   : > { %4085 = vmatprep.subr.bf16.mxu0 %v5136_v42  ;;  %v5362_v15 = vpack.c.bf16 %v1978_v13, %v1976_v12  ;;  %v1979_v22 = vld [vmem:[%s6567_s3 + $0x40] sm:$0xff]  ;;  %v1986_v26 = vld [vmem:[%s6567_s3 + $0x78] sm:$0xff]  ;;  %v1988_v30 = vld [vmem:[%s6567_s3 + $0x88] sm:$0xff] }
  0x4c   : > { %3529 = vmatmul.mubr.msk.f32.vlgmr.msra.gmra.mrb[2].mxu1 %vm419_vm3, %v5143_v47  ;;  %v1983_v27 = vld [vmem:[%s6567_s3 + $0x60] sm:$0xff]  ;;  %v1990_v31 = vld [vmem:[%s6567_s3 + $0x98] sm:$0xff]  ;;  %v1996_v43 = vld [vmem:[%s6567_s3 + $0xc8] sm:$0xff] }
  0x4d   : > { %3519 = vmatmul.mubr.msk.f32.vlgmr.msra.gmra.mrb[0].mxu0 %vm419_vm3, %v5143_v47  ;;  %4117 = vmatpush1.bf16.msra.mxu1 %v5083_v14  ;;  %v1987_v34 = vld [vmem:[%s6567_s3 + $0x80] sm:$0xff]  ;;  %v1994_v37 = vld [vmem:[%s6567_s3 + $0xb8] sm:$0xff]  ;;  %v2001_v53 = vld [vmem:[%s6567_s3 + $0xf0] sm:$0xff] }
  0x4e   : > { %4087 = vmatpush1.bf16.msra.mxu0 %v5149_v48  ;;  %4120 = vmatprep.subr.msk.bf16.mxu1 %vm5071_vm2, %v5089_v19  ;;  %v1991_v40 = vld [vmem:[%s6567_s3 + $0xa0] sm:$0xff]  ;;  %v1998_v44 = vld [vmem:[%s6567_s3 + $0xd8] sm:$0xff]  ;;  %v3577_v58 = vld [vmem:[%s6567_s3 + $0x108] sm:$0xff] }
  0x4f   : > { %4090 = vmatprep.subr.msk.bf16.mxu0 %vm5071_vm2, %v5152_v49  ;;  %758 = vmatprep.mubr.f32.mxu0 %v6579_v0  ;;  %v5454_v45 = vpack.c.bf16 %v1998_v44, %v1996_v43  ;;  %v1995_v46 = vld [vmem:[%s6567_s3 + $0xc0] sm:$0xff]  ;;  %v2002_v50 = vld [vmem:[%s6567_s3 + $0xf8] sm:$0xff]  ;;  %v3581_v2 = vld [vmem:[%s6567_s3 + $0x128] sm:$0xff] }
  0x50   : > { %994 = vmatprep.mubr.f32.mxu1 %v6579_v0  ;;  %v1999_v52 = vld [vmem:[%s6567_s3 + $0xe0] sm:$0xff]  ;;  %v3611_v56 = vld [vmem:[%s6567_s3 + $0x218] sm:$0xff]  ;;  %v3586_v12 = vld [vmem:[%s6567_s3 + $0x150] sm:$0xff] }
  0x51   : > { %4123 = vmatpush1.bf16.msk.msra.mxu1 %vm5071_vm2, %v5105_v25  ;;  %v3579_v59 = vld [vmem:[%s6567_s3 + $0x118] sm:$0xff]  ;;  %v3601_v43 = vld [vmem:[%s6567_s3 + $0x1c8] sm:$0xff] }
  0x52   : > { %4093 = vmatpush1.bf16.msk.msra.mxu0 %vm5071_vm2, %v5163_v54  ;;  %4125 = vmatprep.subr.bf16.mxu1 %v5107_v29  ;;  %v3603_v44 = vld [vmem:[%s6567_s3 + $0x1d8] sm:$0xff] }
  0x53   : > { %4095 = vmatprep.subr.bf16.mxu0 %v5169_v55 }
  0x54   : > { %3532 = vmatmul.mubr.msk.f32.vlgmr.msra.gmra.mrb[2].mxu1 %vm419_vm3, %v3509_v33  ;;  %v5416_v33 = vpack.c.bf16 %v1990_v31, %v1988_v30  ;;  %v3594_v30 = vld [vmem:[%s6567_s3 + $0x190] sm:$0xff] }
  0x55   : > { %3523 = vmatmul.mubr.msk.f32.vlgmr.msra.gmra.mrb[0].mxu0 %vm419_vm3, %v5179_v60  ;;  %4127 = vmatpush1.bf16.msra.mxu1 %v5118_v35 }
  0x56   : > { %4097 = vmatpush1.bf16.msra.mxu0 %v5182_v61  ;;  %4130 = vmatprep.subr.msk.bf16.mxu1 %vm5071_vm2, %v5121_v36 }
  0x57   : > { %4100 = vmatprep.subr.msk.bf16.mxu0 %vm5071_vm2, %v5185_v62  ;;  %850 = vmatprep.mubr.f32.mxu0 %v6579_v0 }
  0x58   : > { %1065 = vmatprep.mubr.f32.mxu1 %v6579_v0 }
  0x59   : > { %4133 = vmatpush1.bf16.msk.msra.mxu1 %vm5071_vm2, %v5130_v41 }
  0x5a   : > { %4103 = vmatpush1.bf16.msk.msra.mxu0 %vm5071_vm2, %v5195_v3  ;;  %4135 = vmatprep.subr.bf16.mxu1 %v5136_v42 }
  0x5b   : > { %4155 = vmatprep.subr.bf16.mxu0 %v5075_v5 }
  0x5c   : > { %3535 = vmatmul.mubr.msk.f32.vlgmr.msra.gmra.mrb[2].mxu1 %vm419_vm3, %v5179_v60 }
  0x5d   : > { %3526 = vmatmul.mubr.msk.f32.vlgmr.msra.gmra.mrb[0].mxu0 %vm419_vm3, %v767_v4  ;;  %4137 = vmatpush1.bf16.msra.mxu1 %v5149_v48 }
  0x5e   : > { %4157 = vmatpush1.bf16.msra.mxu0 %v5079_v10  ;;  %4140 = vmatprep.subr.msk.bf16.mxu1 %vm5071_vm2, %v5152_v49 }
  0x5f   : > { %4160 = vmatprep.subr.msk.bf16.mxu0 %vm5071_vm2, %v5087_v18  ;;  %1138 = vmatprep.mubr.f32.mxu1 %v6579_v0 }
  0x60   : > { %1288 = vmatprep.mubr.f32.mxu0 %v6579_v0 }
  0x61   : > { %4143 = vmatpush1.bf16.msk.msra.mxu1 %vm5071_vm2, %v5163_v54 }
  0x62   : > { %4163 = vmatpush1.bf16.msk.msra.mxu0 %vm5071_vm2, %v5092_v23  ;;  %4145 = vmatprep.subr.bf16.mxu1 %v5169_v55 }
  0x63   : > { %4165 = vmatprep.subr.bf16.mxu0 %v5077_v9 }
  0x64   : > { %3538 = vmatmul.mubr.msk.f32.vlgmr.msra.gmra.mrb[2].mxu1 %vm419_vm3, %v767_v4 }
  0x65   : > { %3545 = vmatmul.mubr.msk.f32.vlgmr.msra.gmra.mrb[2].mxu0 %vm419_vm3, %v5179_v60  ;;  %4147 = vmatpush1.bf16.msra.mxu1 %v5182_v61 }
  0x66   : > { %4167 = vmatpush1.bf16.msra.mxu0 %v5083_v14  ;;  %4150 = vmatprep.subr.msk.bf16.mxu1 %vm5071_vm2, %v5185_v62 }
  0x67   : > { %4170 = vmatprep.subr.msk.bf16.mxu0 %vm5071_vm2, %v5089_v19  ;;  %1215 = vmatprep.mubr.f32.mxu1 %v6579_v0 }
  0x68   : > { %1359 = vmatprep.mubr.f32.mxu0 %v6579_v0 }
  0x69   : > { %4153 = vmatpush1.bf16.msk.msra.mxu1 %vm5071_vm2, %v5195_v3 }
  0x6a   : > { %4173 = vmatpush1.bf16.msk.msra.mxu0 %vm5071_vm2, %v5105_v25  ;;  %4205 = vmatprep.subr.bf16.mxu1 %v5075_v5  ;;  %v3555_v5 = vld [vmem:[%s5097_s16 + $0x11] sm:$0x3f]  ;;  %s6522_s16 = scalar_lea.hbm %s6575_s11, %s3756_s24 }
  0x6b   : > { %4175 = vmatprep.subr.bf16.mxu0 %v5107_v29 }
  0x6c   : > { %3542 = vmatmul.mubr.msk.f32.vlgmr.msra.gmra.mrb[2].mxu1 %vm419_vm3, %v3539_v6 }
  0x6d   : > { %3548 = vmatmul.mubr.msk.f32.vlgmr.msra.gmra.mrb[2].mxu0 %vm419_vm3, %v5143_v47  ;;  %4207 = vmatpush1.bf16.msra.mxu1 %v5079_v10  ;;  %v1971_v10 = vld [vmem:[%s6567_s3] sm:$0xff]  ;;  %v1997_v47 = vld [vmem:[%s6567_s3 + $0xd0] sm:$0xff] }
  0x6e   : > { %4177 = vmatpush1.bf16.msra.mxu0 %v5118_v35  ;;  %4210 = vmatprep.subr.msk.bf16.mxu1 %vm5071_vm2, %v5087_v18  ;;  %v5372_v18 = vpack.c.bf16 %v1977_v17, %v1975_v16  ;;  %v3589_v16 = vld [vmem:[%s6567_s3 + $0x168] sm:$0xff]  ;;  %v3591_v17 = vld [vmem:[%s6567_s3 + $0x178] sm:$0xff] }
  0x6f   : > { %4180 = vmatprep.subr.msk.bf16.mxu0 %vm5071_vm2, %v5121_v36  ;;  %1430 = vmatprep.mubr.f32.mxu0 %v6579_v0 }
  0x70   : > { %1653 = vmatprep.mubr.f32.mxu1 %v6579_v0 }
  0x71   : > { %4213 = vmatpush1.bf16.msk.msra.mxu1 %vm5071_vm2, %v5092_v23  ;;  %v1981_v23 = vld [vmem:[%s6567_s3 + $0x50] sm:$0xff] }
  0x72   : > { %4183 = vmatpush1.bf16.msk.msra.mxu0 %vm5071_vm2, %v5130_v41  ;;  %4215 = vmatprep.subr.bf16.mxu1 %v5077_v9  ;;  %v1974_v9 = vld [vmem:[%s6567_s3 + $0x18] sm:$0xff]  ;;  %v5390_v24 = vpack.c.bf16 %v1981_v23, %v1979_v22  ;;  %v3590_v22 = vld [vmem:[%s6567_s3 + $0x170] sm:$0xff] }
  0x73   : > { %4185 = vmatprep.subr.bf16.mxu0 %v5136_v42  ;;  %v5349_v11 = vpack.c.bf16 %v1974_v9, %v1972_v8  ;;  %v3585_v8 = vld [vmem:[%s6567_s3 + $0x148] sm:$0xff]  ;;  %v3587_v9 = vld [vmem:[%s6567_s3 + $0x158] sm:$0xff] }
  0x74   : > { %3561 = vmatmul.mubr.msk.f32.vlgmr.msra.gmra.mrb[4].mxu1 %vm419_vm3, %v767_v4 }
  0x75   : > { %3551 = vmatmul.mubr.msk.f32.vlgmr.msra.gmra.mrb[2].mxu0 %vm419_vm3, %v767_v4  ;;  %4217 = vmatpush1.bf16.msra.mxu1 %v5083_v14  ;;  %v5360_v14 = vpack.c.bf16 %v1973_v1, %v1971_v10  ;;  %v5532_v10 = vpack.c.bf16 %v3587_v9, %v3585_v8  ;;  %v3584_v1 = vld [vmem:[%s6567_s3 + $0x140] sm:$0xff] }
  0x76   : > { %4187 = vmatpush1.bf16.msra.mxu0 %v5149_v48  ;;  %4220 = vmatprep.subr.msk.bf16.mxu1 %vm5071_vm2, %v5089_v19  ;;  %v1980_v19 = vld [vmem:[%s6567_s3 + $0x48] sm:$0xff]  ;;  %v5540_v13 = vpack.c.bf16 %v3586_v12, %v3584_v1 }
  0x77   : > { %4190 = vmatprep.subr.msk.bf16.mxu0 %vm5071_vm2, %v5152_v49  ;;  %1503 = vmatprep.mubr.f32.mxu0 %v6579_v0  ;;  %v5382_v21 = vpack.c.bf16 %v1982_v20, %v1980_v19  ;;  %v5550_v19 = vpack.c.bf16 %v3591_v17, %v3589_v16  ;;  %v3588_v20 = vld [vmem:[%s6567_s3 + $0x160] sm:$0xff] }
  0x78   : > { %1724 = vmatprep.mubr.f32.mxu1 %v6579_v0  ;;  %v5558_v23 = vpack.c.bf16 %v3590_v22, %v3588_v20  ;;  %v5637_v16 = vld [vmem:[%s6566_s2] ss:$0 sm:$0xff]  ;;  %v3610_v20 = vld [vmem:[%s6567_s3 + $0x210] sm:$0xff]  ;;  %v3613_v22 = vld [vmem:[%s6567_s3 + $0x228] sm:$0xff] }
  0x79   : > { %4223 = vmatpush1.bf16.msk.msra.mxu1 %vm5071_vm2, %v5105_v25  ;;  %v1984_v25 = vld [vmem:[%s6567_s3 + $0x68] sm:$0xff] }
  0x7a   : > { %4193 = vmatpush1.bf16.msk.msra.mxu0 %vm5071_vm2, %v5163_v54  ;;  %4225 = vmatprep.subr.bf16.mxu1 %v5107_v29  ;;  %v5403_v28 = vpack.c.bf16 %v1986_v26, %v1984_v25  ;;  %v1985_v29 = vld [vmem:[%s6567_s3 + $0x70] sm:$0xff]  ;;  %v3593_v25 = vld [vmem:[%s6567_s3 + $0x188] sm:$0xff]  ;;  %v3595_v26 = vld [vmem:[%s6567_s3 + $0x198] sm:$0xff] }
  0x7b   : > { %4195 = vmatprep.subr.bf16.mxu0 %v5169_v55  ;;  %v5414_v32 = vpack.c.bf16 %v1985_v29, %v1983_v27  ;;  %v5568_v27 = vpack.c.bf16 %v3595_v26, %v3593_v25  ;;  %v3592_v29 = vld [vmem:[%s6567_s3 + $0x180] sm:$0xff]  ;;  %v3615_v25 = vld [vmem:[%s6567_s3 + $0x238] sm:$0xff] }
  0x7c   : > { %3564 = vmatmul.mubr.msk.f32.vlgmr.msra.gmra.mrb[4].mxu1 %vm419_vm3, %v5179_v60  ;;  %v4254_v60 = vpack.c.bf16 %v3579_v59, %v3577_v58  ;;  %v5576_v31 = vpack.c.bf16 %v3594_v30, %v3592_v29  ;;  %v3606_v58 = vld [vmem:[%s6567_s3 + $0x1f0] sm:$0xff] }
  0x7d   : > { %3554 = vmatmul.mubr.msk.f32.vlgmr.msra.gmra.mrb[2].mxu0 %vm419_vm3, %v3539_v6  ;;  %4227 = vmatpush1.bf16.msra.mxu1 %v5118_v35  ;;  %v1989_v35 = vld [vmem:[%s6567_s3 + $0x90] sm:$0xff] }
  0x7e   : > { %4197 = vmatpush1.bf16.msra.mxu0 %v5182_v61  ;;  %4230 = vmatprep.subr.msk.bf16.mxu1 %vm5071_vm2, %v5121_v36  ;;  %v1992_v36 = vld [vmem:[%s6567_s3 + $0xa8] sm:$0xff]  ;;  %v5432_v38 = vpack.c.bf16 %v1989_v35, %v1987_v34  ;;  %v3599_v35 = vld [vmem:[%s6567_s3 + $0x1b8] sm:$0xff] }
  0x7f   : > { %4200 = vmatprep.subr.msk.bf16.mxu0 %vm5071_vm2, %v5185_v62  ;;  %1580 = vmatprep.mubr.f32.mxu0 %v6579_v0  ;;  %v5435_v39 = vpack.c.bf16 %v1994_v37, %v1992_v36  ;;  %v3597_v34 = vld [vmem:[%s6567_s3 + $0x1a8] sm:$0xff]  ;;  %v3596_v37 = vld [vmem:[%s6567_s3 + $0x1a0] sm:$0xff] }
  0x80   : > { %1795 = vmatprep.mubr.f32.mxu1 %v6579_v0  ;;  %v5586_v36 = vpack.c.bf16 %v3599_v35, %v3597_v34  ;;  %v5656_v34 = vpack.c.bf16 %v3615_v25, %v3613_v22  ;;  %v3612_v35 = vld [vmem:[%s6567_s3 + $0x220] sm:$0xff]  ;;  %v3630_v25 = vld [vmem:[%s6567_s3 + $0x2b0] sm:$0xff] }
  0x81   : > { %4233 = vmatpush1.bf16.msk.msra.mxu1 %vm5071_vm2, %v5130_v41  ;;  %v1993_v41 = vld [vmem:[%s6567_s3 + $0xb0] sm:$0xff]  ;;  %v3628_v22 = vld [vmem:[%s6567_s3 + $0x2a0] sm:$0xff] }
  0x82   : > { %4203 = vmatpush1.bf16.msk.msra.mxu0 %vm5071_vm2, %v5195_v3  ;;  %4235 = vmatprep.subr.bf16.mxu1 %v5136_v42  ;;  %v5444_v42 = vpack.c.bf16 %v1993_v41, %v1991_v40  ;;  %v3598_v40 = vld [vmem:[%s6567_s3 + $0x1b0] sm:$0xff] }
  0x83   : > { %4287 = vmatprep.subr.bf16.mxu0 %v5349_v11  ;;  %v5594_v41 = vpack.c.bf16 %v3598_v40, %v3596_v37  ;;  %v3614_v37 = vld [vmem:[%s6567_s3 + $0x230] sm:$0xff]  ;;  %v3617_v40 = vld [vmem:[%s6567_s3 + $0x248] sm:$0xff] }
  0x84   : > { %3567 = vmatmul.mubr.msk.f32.vlgmr.msra.gmra.mrb[4].mxu1 %vm419_vm3, %v3539_v6  ;;  %v3580_v6 = vld [vmem:[%s6567_s3 + $0x120] sm:$0xff] }
  0x85   : > { %3558 = vmatmul.mubr.msk.f32.vlgmr.msra.gmra.mrb[2].mxu0 %vm419_vm3, %v3555_v5  ;;  %4237 = vmatpush1.bf16.msra.mxu1 %v5149_v48  ;;  %v5462_v48 = vpack.c.bf16 %v1997_v47, %v1995_v46  ;;  %v5604_v46 = vpack.c.bf16 %v3603_v44, %v3601_v43  ;;  %v3600_v47 = vld [vmem:[%s6567_s3 + $0x1c0] sm:$0xff]  ;;  %v3619_v43 = vld [vmem:[%s6567_s3 + $0x258] sm:$0xff]  ;;  %v5672_v44 = vpack.c.bf16 %v3614_v37, %v3612_v35  ;;  %v3633_v35 = vld [vmem:[%s6567_s3 + $0x2c8] sm:$0xff] }
  0x86   : > { %4240 = vmatprep.subr.msk.bf16.mxu1 %vm5071_vm2, %v5152_v49  ;;  %1868 = vmatprep.mubr.f32.mxu1 %v6579_v0  ;;  %v2000_v49 = vld [vmem:[%s6567_s3 + $0xe8] sm:$0xff]  ;;  %v3635_v37 = vld [vmem:[%s6567_s3 + $0x2d8] sm:$0xff] }
  0x87   : > { %2171 = vmatprep.mubr.f32.mxu0 %v6579_v0  ;;  %4289 = vmatpush1.bf16.msra.mxu0 %v5360_v14  ;;  %v5472_v51 = vpack.c.bf16 %v2002_v50, %v2000_v49  ;;  %v3602_v49 = vld [vmem:[%s6567_s3 + $0x1d0] sm:$0xff] }
  0x88   : > { %4291 = vmatprep.subr.bf16.mxu0 %v5362_v15  ;;  %v5612_v50 = vpack.c.bf16 %v3602_v49, %v3600_v47  ;;  %v5676_v47 = vpack.c.bf16 %v3619_v43, %v3617_v40  ;;  %v3616_v49 = vld [vmem:[%s6567_s3 + $0x240] sm:$0xff]  ;;  %v5745_v43 = vpack.c.bf16 %v3630_v25, %v3628_v22 }
  0x89   : > { %4243 = vmatpush1.bf16.msk.msra.mxu1 %vm5071_vm2, %v5163_v54  ;;  %v5480_v54 = vpack.c.bf16 %v2001_v53, %v1999_v52  ;;  %v3605_v52 = vld [vmem:[%s6567_s3 + $0x1e8] sm:$0xff]  ;;  %v3607_v53 = vld [vmem:[%s6567_s3 + $0x1f8] sm:$0xff]  ;;  %v3640_v25 = vld [vmem:[%s6567_s3 + $0x300] sm:$0xff] }
  0x8a   : > { %4245 = vmatprep.subr.bf16.mxu1 %v5169_v55  ;;  %v3609_v55 = vld [vmem:[%s6567_s3 + $0x208] sm:$0xff] }
  0x8b   : > { %4293 = vmatpush1.bf16.msra.mxu0 %v5372_v18  ;;  %v5490_v57 = vpack.c.bf16 %v3611_v56, %v3609_v55  ;;  %v5622_v55 = vpack.c.bf16 %v3607_v53, %v3605_v52  ;;  %v3604_v56 = vld [vmem:[%s6567_s3 + $0x1e0] sm:$0xff]  ;;  %v3618_v52 = vld [vmem:[%s6567_s3 + $0x250] sm:$0xff]  ;;  %v3621_v53 = vld [vmem:[%s6567_s3 + $0x268] sm:$0xff] }
  0x8c   : > { %3570 = vmatmul.mubr.msk.f32.vlgmr.msra.gmra.mrb[4].mxu1 %vm419_vm3, %v3555_v5  ;;  %4295 = vmatprep.subr.bf16.mxu0 %v5382_v21  ;;  %v3582_v5 = vld [vmem:[%s6567_s3 + $0x130] sm:$0xff]  ;;  %v5630_v59 = vpack.c.bf16 %v3606_v58, %v3604_v56  ;;  %v3623_v56 = vld [vmem:[%s6567_s3 + $0x278] sm:$0xff]  ;;  %v5691_v58 = vpack.c.bf16 %v3618_v52, %v3616_v49  ;;  %v5748_v49 = vpack.c.bf16 %v3635_v37, %v3633_v35  ;;  %v3632_v52 = vld [vmem:[%s6567_s3 + $0x2c0] sm:$0xff] }
  0x8d   : > { %4247 = vmatpush1.bf16.msra.mxu1 %v5182_v61  ;;  %1945 = vmatprep.mubr.f32.mxu1 %v6579_v0  ;;  %v3576_v61 = vld [vmem:[%s6567_s3 + $0x100] sm:$0xff]  ;;  %v3642_v35 = vld [vmem:[%s6567_s3 + $0x310] sm:$0xff]  ;;  %v3645_v37 = vld [vmem:[%s6567_s3 + $0x328] sm:$0xff] }
  0x8e   : > { %4250 = vmatprep.subr.msk.bf16.mxu1 %vm5071_vm2, %v5185_v62  ;;  %v3578_v62 = vld [vmem:[%s6567_s3 + $0x110] sm:$0xff] }
  0x8f   : > { %4297 = vmatpush1.bf16.msra.mxu0 %v5390_v24  ;;  %v5505_v63 = vpack.c.bf16 %v3578_v62, %v3576_v61 }
  0x90   : > { %4299 = vmatprep.subr.bf16.mxu0 %v5403_v28 }
  0x91   : > { %4253 = vmatpush1.bf16.msk.msra.mxu1 %vm5071_vm2, %v5195_v3  ;;  %v3583_v3 = vld [vmem:[%s6567_s3 + $0x138] sm:$0xff] }
  0x92   : > { %4255 = vmatprep.subr.bf16.mxu1 %v4254_v60  ;;  %v5514_v4 = vpack.c.bf16 %v3583_v3, %v3581_v2 }
  0x93   : > { %4301 = vmatpush1.bf16.msra.mxu0 %v5414_v32 }
  0x94   : > { %3574 = vmatmul.mubr.msk.f32.vlgmr.msra.gmra.mrb[4].mxu1 %vm419_vm3, %v3571_v7  ;;  %4303 = vmatprep.subr.bf16.mxu0 %v5416_v33  ;;  %v5522_v7 = vpack.c.bf16 %v3582_v5, %v3580_v6 }
  0x95   : > { %2100 = vmatprep.mubr.f32.mxu1 %v6579_v0  ;;  %4257 = vmatpush1.bf16.msra.mxu1 %v5505_v63 }
  0x96   : > { %4259 = vmatprep.subr.bf16.mxu1 %v5514_v4 }
  0x97   : > { %4305 = vmatpush1.bf16.msra.mxu0 %v5432_v38 }
  0x98   : > { %4307 = vmatprep.subr.bf16.mxu0 %v5435_v39 }
  0x99   : > { %4261 = vmatpush1.bf16.msra.mxu1 %v5522_v7 }
  0x9a   : > { %4263 = vmatprep.subr.bf16.mxu1 %v5532_v10 }
  0x9b   : > { %4309 = vmatpush1.bf16.msra.mxu0 %v5444_v42 }
  0x9c   : > { %4311 = vmatprep.subr.bf16.mxu0 %v5454_v45 }
  0x9d   : > { %4265 = vmatpush1.bf16.msra.mxu1 %v5540_v13 }
  0x9e   : > { %4267 = vmatprep.subr.bf16.mxu1 %v5550_v19 }
  0x9f   : > { %4313 = vmatpush1.bf16.msra.mxu0 %v5462_v48 }
  0xa0   : > { %4315 = vmatprep.subr.bf16.mxu0 %v5472_v51 }
  0xa1   : > { %4269 = vmatpush1.bf16.msra.mxu1 %v5558_v23 }
  0xa2   : > { %4271 = vmatprep.subr.bf16.mxu1 %v5568_v27 }
  0xa3   : > { %4317 = vmatpush1.bf16.msra.mxu0 %v5480_v54 }
  0xa4   : > { %4319 = vmatprep.subr.bf16.mxu0 %v5490_v57 }
  0xa5   : > { %4273 = vmatpush1.bf16.msra.mxu1 %v5576_v31 }
  0xa6   : > { %4275 = vmatprep.subr.bf16.mxu1 %v5586_v36 }
  0xa9   : > { %4277 = vmatpush1.bf16.msra.mxu1 %v5594_v41 }
  0xaa   : > { %4279 = vmatprep.subr.bf16.mxu1 %v5604_v46 }
  0xad   : > { %4281 = vmatpush1.bf16.msra.mxu1 %v5612_v50 }
  0xae   : > { %4283 = vmatprep.subr.bf16.mxu1 %v5622_v55 }
  0xb1   : > { %4285 = vmatpush1.bf16.msra.mxu1 %v5630_v59 }
  0xb2   : > { %4415 = vmatprep.subr.bf16.mxu1 %v4254_v60  ;;  %v3608_v60 = vld [vmem:[%s6567_s3 + $0x200] sm:$0xff] }
  0xb3   : > { %v5652_v29 = vpack.c.bf16 %v3610_v20, %v3608_v60 }
 0x117   : > { %v496_v61 = vpop.f32.mrb[0].mxu1 }
 0x118   : > { %v498_v62 = vpop.f32.mrb[1].mxu1 }
 0x130   : > { %v852_v2 = vpop.f32.mrb[0].mxu0 }
 0x131   : > { %v4706_v3 = vadd.f32 %v852_v2, %v496_v61  ;;  %v854_v6 = vpop.f32.mrb[1].mxu0  ;;  %v5694_v61 = vpack.c.bf16 %v3623_v56, %v3621_v53  ;;  %v3622_v2 = vld [vmem:[%s6567_s3 + $0x270] sm:$0xff]  ;;  %v3637_v56 = vld [vmem:[%s6567_s3 + $0x2e8] sm:$0xff] }
 0x132   : > { %v4707_v5 = vadd.f32 %v854_v6, %v498_v62  ;;  %v3620_v62 = vld [vmem:[%s6567_s3 + $0x260] sm:$0xff]  ;;  %v3627_v6 = vld [vmem:[%s6567_s3 + $0x298] sm:$0xff]  ;;  %v3634_v53 = vld [vmem:[%s6567_s3 + $0x2d0] sm:$0xff] }
 0x13f   : > { %v1217_v8 = vpop.f32.mrb[2].mxu1 }
 0x140   : > { %v1954_v9 = vmax.f32 %v4706_v3, %v1217_v8  ;;  %v1219_v1 = vpop.f32.mrb[3].mxu1  ;;  %v3625_v3 = vld [vmem:[%s6567_s3 + $0x288] sm:$0xff] }
 0x141   : > { %v1955_v12 = vmax.f32 %v4707_v5, %v1219_v1  ;;  %v5709_v5 = vpack.c.bf16 %v3622_v2, %v3620_v62  ;;  %v5712_v8 = vpack.c.bf16 %v3627_v6, %v3625_v3  ;;  %v3626_v1 = vld [vmem:[%s6567_s3 + $0x290] sm:$0xff]  ;;  %v3639_v62 = vld [vmem:[%s6567_s3 + $0x2f8] sm:$0xff]  ;;  %v5763_v2 = vpack.c.bf16 %v3634_v53, %v3632_v52  ;;  %v3636_v6 = vld [vmem:[%s6567_s3 + $0x2e0] sm:$0xff] }
 0x142   : > { %v5766_v3 = vpack.c.bf16 %v3639_v62, %v3637_v56  ;;  %v3647_v52 = vld [vmem:[%s6567_s3 + $0x338] sm:$0xff]  ;;  %v5799_v53 = vpack.c.bf16 %v3642_v35, %v3640_v25  ;;  %v3649_v25 = vld [vmem:[%s6567_s3 + $0x348] sm:$0xff] }
 0x143   : > { %v1956_v17 = vmax.f32 %v1954_v9, %v1955_v12  ;;  %v3624_v9 = vld [vmem:[%s6567_s3 + $0x280] sm:$0xff]  ;;  %v3629_v12 = vld [vmem:[%s6567_s3 + $0x2a8] sm:$0xff]  ;;  %v3651_v35 = vld [vmem:[%s6567_s3 + $0x358] sm:$0xff] }
 0x144   : > { %v5727_v60 = vpack.c.bf16 %v3626_v1, %v3624_v9  ;;  %v3638_v9 = vld [vmem:[%s6567_s3 + $0x2f0] sm:$0xff]  ;;  %v3641_v1 = vld [vmem:[%s6567_s3 + $0x308] sm:$0xff] }
 0x145   : > { %v1964_v26 = vadd.f32 %v5637_v16, %v1956_v17  ;;  %v3631_v17 = vld [vmem:[%s6567_s3 + $0x2b8] sm:$0xff] }
 0x146   : > { %v5730_v20 = vpack.c.bf16 %v3631_v17, %v3629_v12  ;;  %v3643_v12 = vld [vmem:[%s6567_s3 + $0x318] sm:$0xff]  ;;  %v5781_v17 = vpack.c.bf16 %v3638_v9, %v3636_v6  ;;  %v5803_v6 = vpack.c.bf16 %v3647_v52, %v3645_v37  ;;  %v3644_v9 = vld [vmem:[%s6567_s3 + $0x320] sm:$0xff] }
 0x147   : > { %v5654_v30 = vmax.f32 %v1964_v26, 0.0  ;;  %v5784_v22 = vpack.c.bf16 %v3643_v12, %v3641_v1  ;;  %v3646_v1 = vld [vmem:[%s6567_s3 + $0x330] sm:$0xff] }
 0x148   : > { %6594 = vst [vmem:[#allocation9_spill] sm:$0xff] %v5781_v17  ;;  %v5820_v52 = vpack.c.bf16 %v3646_v1, %v3644_v9  ;;  %v3655_v9 = vld [vmem:[%s6567_s3 + $0x378] sm:$0xff] }
 0x149   : > { %2172 = vmatmul.mubr.f32.vlgmr.msra.gmra.mrb[4].mxu0 %v5654_v30  ;;  %6595 = vst [vmem:[#allocation10_spill] sm:$0xff] %v5784_v22  ;;  %v6583_v62 = vrot.slane %v5654_v30, 1 }
 0x14a   : > { %4321 = vmatpush1.bf16.msra.mxu0 %v5652_v29  ;;  %2278 = vmatprep.mubr.f32.mxu0 %v6579_v0 }
 0x14b   : > { %4323 = vmatprep.subr.bf16.mxu0 %v5656_v34 }
 0x14e   : > { %4325 = vmatpush1.bf16.msra.mxu0 %v5672_v44 }
 0x14f   : > { %4327 = vmatprep.subr.bf16.mxu0 %v5676_v47 }
 0x152   : > { %4329 = vmatpush1.bf16.msra.mxu0 %v5691_v58 }
 0x153   : > { %4331 = vmatprep.subr.bf16.mxu0 %v5694_v61 }
 0x156   : > { %4333 = vmatpush1.bf16.msra.mxu0 %v5709_v5 }
 0x157   : > { %4335 = vmatprep.subr.bf16.mxu0 %v5712_v8 }
 0x158   : > { %v1582_v26 = vpop.f32.mrb[2].mxu0 }
 0x159   : > { %v1584_v40 = vpop.f32.mrb[3].mxu0 }
 0x15a   : > { %4337 = vmatpush1.bf16.msra.mxu0 %v5727_v60 }
 0x15b   : > { %4339 = vmatprep.subr.bf16.mxu0 %v5730_v20 }
 0x15e   : > { %4341 = vmatpush1.bf16.msra.mxu0 %v5745_v43 }
 0x15f   : > { %4343 = vmatprep.subr.bf16.mxu0 %v5748_v49 }
 0x162   : > { %4345 = vmatpush1.bf16.msra.mxu0 %v5763_v2 }
 0x163   : > { %4347 = vmatprep.subr.bf16.mxu0 %v5766_v3 }
 0x166   : > { %4349 = vmatpush1.bf16.msra.mxu0 %v5781_v17  ;;  %v3648_v17 = vld [vmem:[%s6567_s3 + $0x340] sm:$0xff] }
 0x167   : > { %v1947_v56 = vpop.f32.mrb[4].mxu1  ;;  %4351 = vmatprep.subr.bf16.mxu0 %v5784_v22  ;;  %v6596_v22 = vmov 0.0  }
 0x168   : > { %v1966_v12 = vmax.f32 %v1582_v26, %v1947_v56  ;;  %v1949_v0 = vpop.f32.mrb[5].mxu1  ;;  %v5824_v56 = vpack.c.bf16 %v3651_v35, %v3649_v25 }
 0x169   : > { %v1967_v37 = vmax.f32 %v1584_v40, %v1949_v0  ;;  %2279 = vmatmul.mubr.f32.vlgmr.msra.gmra.mrb[4].mxu0 %v6583_v62  ;;  %v3650_v0 = vld [vmem:[%s6567_s3 + $0x350] sm:$0xff]  ;;  %v3653_v40 = vld [vmem:[%s6567_s3 + $0x368] sm:$0xff] }
 0x16a   : > { %4353 = vmatpush1.bf16.msra.mxu0 %v5799_v53  ;;  %2387 = vmatprep.mubr.f32.mxu0 %v6596_v22  ;;  %v5845_v35 = vpack.c.bf16 %v3655_v9, %v3653_v40  ;;  %v3654_v62 = vld [vmem:[%s6567_s3 + $0x370] sm:$0xff]  ;;  %v3656_v40 = vld [vmem:[%s6567_s3 + $0x380] sm:$0xff] }
 0x16b   : > { %v1968_v26 = vmax.f32 %v1966_v12, %v1967_v37  ;;  %4355 = vmatprep.subr.bf16.mxu0 %v5803_v6  ;;  %v5840_v12 = vpack.c.bf16 %v3650_v0, %v3648_v17  ;;  %v3652_v37 = vld [vmem:[%s6567_s3 + $0x360] sm:$0xff]  ;;  %v3659_v17 = vld [vmem:[%s6567_s3 + $0x398] sm:$0xff]  ;;  %v3658_v9 = vld [vmem:[%s6567_s3 + $0x390] sm:$0xff] }
 0x16d   : > { %v1969_v1 = vadd.f32 %v5637_v16, %v1968_v26  ;;  %v3657_v16 = vld [vmem:[%s6567_s3 + $0x388] sm:$0xff]  ;;  %v5862_v26 = vpack.c.bf16 %v3654_v62, %v3652_v37  ;;  %v3663_v62 = vld [vmem:[%s6567_s3 + $0x3b8] sm:$0xff]  ;;  %v3660_v37 = vld [vmem:[%s6567_s3 + $0x3a0] sm:$0xff] }
 0x16e   : > { %4357 = vmatpush1.bf16.msra.mxu0 %v5820_v52  ;;  %v5866_v0 = vpack.c.bf16 %v3659_v17, %v3657_v16  ;;  %v3662_v16 = vld [vmem:[%s6567_s3 + $0x3b0] sm:$0xff]  ;;  %v3667_v17 = vld [vmem:[%s6567_s3 + $0x3d8] sm:$0xff] }
 0x16f   : > { %v5842_v25 = vmax.f32 %v1969_v1, 0.0  ;;  %4359 = vmatprep.subr.bf16.mxu0 %v5824_v56 }
 0x171   : > { %2101 = vmatmul.mubr.f32.vlgmr.msra.gmra.mrb[6].mxu1 %v5842_v25 }
 0x172   : > { %4361 = vmatpush1.bf16.msra.mxu0 %v5840_v12  ;;  %4417 = vmatpush1.bf16.msra.mxu1 %v5505_v63  ;;  %v3661_v63 = vld [vmem:[%s6567_s3 + $0x3a8] sm:$0xff] }
 0x173   : > { %4363 = vmatprep.subr.bf16.mxu0 %v5845_v35  ;;  %4419 = vmatprep.subr.bf16.mxu1 %v5514_v4  ;;  %v5883_v4 = vpack.c.bf16 %v3658_v9, %v3656_v40  ;;  %v5887_v1 = vpack.c.bf16 %v3663_v62, %v3661_v63  ;;  %v3664_v9 = vld [vmem:[%s6567_s3 + $0x3c0] sm:$0xff]  ;;  %v3666_v63 = vld [vmem:[%s6567_s3 + $0x3d0] sm:$0xff]  ;;  %v3671_v62 = vld [vmem:[%s6567_s3 + $0x3f8] sm:$0xff] }
 0x174   : > { %2568 = vmatprep.mubr.f32.mxu1 %v6596_v22 }
 0x176   : > { %4365 = vmatpush1.bf16.msra.mxu0 %v5862_v26  ;;  %4421 = vmatpush1.bf16.msra.mxu1 %v5522_v7  ;;  %v3665_v7 = vld [vmem:[%s6567_s3 + $0x3c8] sm:$0xff] }
 0x177   : > { %4367 = vmatprep.subr.bf16.mxu0 %v5866_v0  ;;  %4423 = vmatprep.subr.bf16.mxu1 %v5532_v10  ;;  %v5903_v10 = vpack.c.bf16 %v3662_v16, %v3660_v37  ;;  %v5907_v40 = vpack.c.bf16 %v3667_v17, %v3665_v7  ;;  %v3668_v16 = vld [vmem:[%s6567_s3 + $0x3e0] sm:$0xff]  ;;  %v3670_v7 = vld [vmem:[%s6567_s3 + $0x3f0] sm:$0xff]  ;;  %v3675_v17 = vld [vmem:[%s6567_s3 + $0x418] sm:$0xff] }
 0x17a   : > { %4369 = vmatpush1.bf16.msra.mxu0 %v5883_v4  ;;  %4425 = vmatpush1.bf16.msra.mxu1 %v5540_v13  ;;  %v3669_v13 = vld [vmem:[%s6567_s3 + $0x3e8] sm:$0xff] }
 0x17b   : > { %4371 = vmatprep.subr.bf16.mxu0 %v5887_v1  ;;  %4427 = vmatprep.subr.bf16.mxu1 %v5550_v19  ;;  %v5923_v19 = vpack.c.bf16 %v3666_v63, %v3664_v9  ;;  %v5927_v37 = vpack.c.bf16 %v3671_v62, %v3669_v13  ;;  %v3672_v63 = vld [vmem:[%s6567_s3 + $0x400] sm:$0xff]  ;;  %v3674_v13 = vld [vmem:[%s6567_s3 + $0x410] sm:$0xff]  ;;  %v3679_v62 = vld [vmem:[%s6567_s3 + $0x438] sm:$0xff] }
 0x17e   : > { %4373 = vmatpush1.bf16.msra.mxu0 %v5903_v10  ;;  %4429 = vmatpush1.bf16.msra.mxu1 %v5558_v23  ;;  %v3673_v23 = vld [vmem:[%s6567_s3 + $0x408] sm:$0xff] }
 0x17f   : > { %4375 = vmatprep.subr.bf16.mxu0 %v5907_v40  ;;  %4431 = vmatprep.subr.bf16.mxu1 %v5568_v27  ;;  %v5943_v27 = vpack.c.bf16 %v3670_v7, %v3668_v16  ;;  %v5947_v9 = vpack.c.bf16 %v3675_v17, %v3673_v23  ;;  %v2321_v16 = vrot.slane %v5842_v25, 1  ;;  %v3676_v23 = vld [vmem:[%s6567_s3 + $0x420] sm:$0xff]  ;;  %v3678_v17 = vld [vmem:[%s6567_s3 + $0x430] sm:$0xff] }
 0x182   : > { %4377 = vmatpush1.bf16.msra.mxu0 %v5923_v19  ;;  %4433 = vmatpush1.bf16.msra.mxu1 %v5576_v31  ;;  %v3677_v31 = vld [vmem:[%s6567_s3 + $0x428] sm:$0xff] }
 0x183   : > { %4379 = vmatprep.subr.bf16.mxu0 %v5927_v37  ;;  %4435 = vmatprep.subr.bf16.mxu1 %v5586_v36  ;;  %v5963_v36 = vpack.c.bf16 %v3674_v13, %v3672_v63  ;;  %v5968_v7 = vpack.c.bf16 %v3679_v62, %v3677_v31  ;;  %v3683_v63 = vld [vmem:[%s6567_s3 + $0x458] sm:$0xff]  ;;  %v3680_v31 = vld [vmem:[%s6567_s3 + $0x440] sm:$0xff]  ;;  %v3682_v62 = vld [vmem:[%s6567_s3 + $0x450] sm:$0xff] }
 0x186   : > { %4381 = vmatpush1.bf16.msra.mxu0 %v5943_v27  ;;  %4437 = vmatpush1.bf16.msra.mxu1 %v5594_v41  ;;  %v3681_v41 = vld [vmem:[%s6567_s3 + $0x448] sm:$0xff] }
 0x187   : > { %4383 = vmatprep.subr.bf16.mxu0 %v5947_v9  ;;  %4439 = vmatprep.subr.bf16.mxu1 %v5604_v46  ;;  %v5986_v46 = vpack.c.bf16 %v3678_v17, %v3676_v23  ;;  %v5990_v13 = vpack.c.bf16 %v3683_v63, %v3681_v41  ;;  %v3687_v23 = vld [vmem:[%s6567_s3 + $0x478] sm:$0xff]  ;;  %v3684_v41 = vld [vmem:[%s6567_s3 + $0x460] sm:$0xff]  ;;  %v3686_v63 = vld [vmem:[%s6567_s3 + $0x470] sm:$0xff] }
 0x189   : > { %2388 = vmatmul.mubr.f32.vlgmr.msra.gmra.mrb[4].mxu0 %v2321_v16 }
 0x18a   : > { %4385 = vmatpush1.bf16.msra.mxu0 %v5963_v36  ;;  %4441 = vmatpush1.bf16.msra.mxu1 %v5612_v50  ;;  %v3685_v50 = vld [vmem:[%s6567_s3 + $0x468] sm:$0xff] }
 0x18b   : > { %4387 = vmatprep.subr.bf16.mxu0 %v5968_v7  ;;  %4443 = vmatprep.subr.bf16.mxu1 %v5622_v55  ;;  %v6007_v55 = vpack.c.bf16 %v3682_v62, %v3680_v31  ;;  %v6011_v17 = vpack.c.bf16 %v3687_v23, %v3685_v50  ;;  %v3691_v31 = vld [vmem:[%s6567_s3 + $0x498] sm:$0xff]  ;;  %v6029_v62 = vpack.c.bf16 %v3686_v63, %v3684_v41  ;;  %v3688_v23 = vld [vmem:[%s6567_s3 + $0x480] sm:$0xff] }
 0x18c   : > { %2495 = vmatprep.mubr.f32.mxu0 %v6596_v22  ;;  %v3695_v41 = vld [vmem:[%s6567_s3 + $0x4b8] sm:$0xff] }
 0x18e   : > { %4389 = vmatpush1.bf16.msra.mxu0 %v5986_v46  ;;  %4445 = vmatpush1.bf16.msra.mxu1 %v5630_v59  ;;  %v3689_v59 = vld [vmem:[%s6567_s3 + $0x488] sm:$0xff] }
 0x18f   : > { %4391 = vmatprep.subr.bf16.mxu0 %v5990_v13  ;;  %4447 = vmatprep.subr.bf16.mxu1 %v5349_v11  ;;  %v6597_v11 = vrot.slane %v5654_v30, 1  ;;  %v6033_v50 = vpack.c.bf16 %v3691_v31, %v3689_v59  ;;  %v3692_v59 = vld [vmem:[%s6567_s3 + $0x4a0] sm:$0xff]  ;;  %v3694_v31 = vld [vmem:[%s6567_s3 + $0x4b0] sm:$0xff] }
 0x191   : > { %2569 = vmatmul.mubr.f32.vlgmr.msra.gmra.mrb[8].mxu1 %v6597_v11  ;;  %v3690_v11 = vld [vmem:[%s6567_s3 + $0x490] sm:$0xff] }
 0x192   : > { %4393 = vmatpush1.bf16.msra.mxu0 %v6007_v55  ;;  %4449 = vmatpush1.bf16.msra.mxu1 %v5360_v14  ;;  %v3693_v14 = vld [vmem:[%s6567_s3 + $0x4a8] sm:$0xff] }
 0x193   : > { %4395 = vmatprep.subr.bf16.mxu0 %v6011_v17  ;;  %4451 = vmatprep.subr.bf16.mxu1 %v5362_v15  ;;  %v6050_v15 = vpack.c.bf16 %v3690_v11, %v3688_v23  ;;  %v6054_v63 = vpack.c.bf16 %v3695_v41, %v3693_v14  ;;  %v3699_v23 = vld [vmem:[%s6567_s3 + $0x4d8] sm:$0xff]  ;;  %v3696_v14 = vld [vmem:[%s6567_s3 + $0x4c0] sm:$0xff]  ;;  %v3698_v41 = vld [vmem:[%s6567_s3 + $0x4d0] sm:$0xff] }
 0x194   : > { %2639 = vmatprep.mubr.f32.mxu1 %v6596_v22 }
 0x196   : > { %4397 = vmatpush1.bf16.msra.mxu0 %v6029_v62  ;;  %4453 = vmatpush1.bf16.msra.mxu1 %v5372_v18  ;;  %v3697_v18 = vld [vmem:[%s6567_s3 + $0x4c8] sm:$0xff] }
 0x197   : > { %4399 = vmatprep.subr.bf16.mxu0 %v6033_v50  ;;  %4455 = vmatprep.subr.bf16.mxu1 %v5382_v21  ;;  %v6070_v21 = vpack.c.bf16 %v3694_v31, %v3692_v59  ;;  %v6074_v11 = vpack.c.bf16 %v3699_v23, %v3697_v18  ;;  %v3703_v59 = vld [vmem:[%s6567_s3 + $0x4f8] sm:$0xff]  ;;  %v3700_v18 = vld [vmem:[%s6567_s3 + $0x4e0] sm:$0xff]  ;;  %v3702_v23 = vld [vmem:[%s6567_s3 + $0x4f0] sm:$0xff] }
 0x19a   : > { %4401 = vmatpush1.bf16.msra.mxu0 %v6050_v15  ;;  %4457 = vmatpush1.bf16.msra.mxu1 %v5390_v24  ;;  %v3701_v24 = vld [vmem:[%s6567_s3 + $0x4e8] sm:$0xff] }
 0x19b   : > { %4403 = vmatprep.subr.bf16.mxu0 %v6054_v63  ;;  %4459 = vmatprep.subr.bf16.mxu1 %v5403_v28  ;;  %v6090_v28 = vpack.c.bf16 %v3698_v41, %v3696_v14  ;;  %v6094_v31 = vpack.c.bf16 %v3703_v59, %v3701_v24  ;;  %v3704_v59 = vld [vmem:[%s6568_s4] ss:$0 sm:$0xff] }
 0x19e   : > { %4405 = vmatpush1.bf16.msra.mxu0 %v6070_v21  ;;  %4461 = vmatpush1.bf16.msra.mxu1 %v5414_v32  ;;  %v6104_v32 = vpack.c.bf16 %v3702_v23, %v3700_v18  ;;  %v3706_v18 = vld [vmem:[%s6569_s5 + $0x88] sm:$0xff] }
 0x19f   : > { %4407 = vmatprep.subr.bf16.mxu0 %v6074_v11  ;;  %4463 = vmatprep.subr.bf16.mxu1 %v5416_v33  ;;  %v2429_v33 = vrot.slane %v5654_v30, 2  ;;  %v2884_v30 = vld [vmem:[%s6569_s5 + $0x20] sm:$0xff] }
 0x1a2   : > { %4409 = vmatpush1.bf16.msra.mxu0 %v6090_v28  ;;  %4465 = vmatpush1.bf16.msra.mxu1 %v5432_v38  ;;  %v6598_v38 = vld [vmem:[#allocation9_spill] sm:$0xff] }
 0x1a3   : > { %4411 = vmatprep.subr.bf16.mxu0 %v6094_v31  ;;  %4467 = vmatprep.subr.bf16.mxu1 %v5435_v39  ;;  %v6599_v39 = vld [vmem:[#allocation10_spill] sm:$0xff] }
 0x1a6   : > { %4413 = vmatpush1.bf16.msra.mxu0 %v6104_v32  ;;  %4469 = vmatpush1.bf16.msra.mxu1 %v5444_v42  ;;  %v2880_v42 = vld [vmem:[%s6569_s5] sm:$0xff] }
 0x1a7   : > { %4471 = vmatprep.subr.bf16.mxu1 %v5454_v45  ;;  %v2881_v45 = vld [vmem:[%s6569_s5 + $0x8] sm:$0xff] }
 0x1a9   : > { %2496 = vmatmul.mubr.f32.vlgmr.msra.gmra.mrb[4].mxu0 %v2429_v33 }
 0x1aa   : > { %4473 = vmatpush1.bf16.msra.mxu1 %v5462_v48  ;;  %v2882_v48 = vld [vmem:[%s6569_s5 + $0x10] sm:$0xff]  ;;  %3888 = vmatprep.mubr.msk.f32.mxu0 %vm4919_vm4, %v6596_v22 }
 0x1ab   : > { %4475 = vmatprep.subr.bf16.mxu1 %v5472_v51  ;;  %v4918_v51 = vmov 0.0|0.0  }
 0x1ac   : > { %4574 = vmatprep.subr.bf16.mxu0 %v4918_v51 }
 0x1ae   : > { %4477 = vmatpush1.bf16.msra.mxu1 %v5480_v54  ;;  %v4575_v54 = vpack.c.bf16 %v2881_v45, %v2880_v42  ;;  %v3709_v45 = vld [vmem:[%s6569_s5 + $0xa0] sm:$0xff] }
 0x1af   : > { %4479 = vmatprep.subr.bf16.mxu1 %v5490_v57  ;;  %v2883_v57 = vld [vmem:[%s6569_s5 + $0x18] sm:$0xff] }
 0x1b0   : > { %4576 = vmatpush3.bf16.msra.mxu0 %v4575_v54 }
 0x1b1   : > { %2640 = vmatmul.mubr.f32.vlgmr.msra.gmra.mrb[8].mxu1 %v5842_v25  ;;  %4577 = vmatprep.subr.bf16.mxu0 %v4918_v51 }
 0x1b2   : > { %4481 = vmatpush1.bf16.msra.mxu1 %v5652_v29  ;;  %2710 = vmatprep.mubr.f32.mxu1 %v6596_v22  ;;  %v4578_v29 = vpack.c.bf16 %v2883_v57, %v2882_v48  ;;  %v3710_v48 = vld [vmem:[%s6569_s5 + $0xa8] sm:$0xff]  ;;  %v3711_v57 = vld [vmem:[%s6569_s5 + $0xb0] sm:$0xff] }
 0x1b3   : > { %4483 = vmatprep.subr.bf16.mxu1 %v5656_v34  ;;  %v2885_v34 = vld [vmem:[%s6569_s5 + $0x28] sm:$0xff]  ;;  %v4605_v54 = vpack.c.bf16 %v3710_v48, %v3709_v45  ;;  %v3749_v48 = vld [vmem:[%s6569_s5 + $0x1e0] sm:$0xff] }
 0x1b4   : > { %4579 = vmatpush3.bf16.msra.mxu0 %v4578_v29  ;;  %v3712_v29 = vld [vmem:[%s6569_s5 + $0xb8] sm:$0xff] }
 0x1b5   : > { %4580 = vmatprep.subr.bf16.mxu0 %v4918_v51 }
 0x1b6   : > { %4485 = vmatpush1.bf16.msra.mxu1 %v5672_v44  ;;  %v4581_v44 = vpack.c.bf16 %v2885_v34, %v2884_v30  ;;  %v4608_v30 = vpack.c.bf16 %v3712_v29, %v3711_v57  ;;  %v3713_v34 = vld [vmem:[%s6569_s5 + $0xc0] sm:$0xff]  ;;  %v3751_v29 = vld [vmem:[%s6569_s5 + $0x1f0] sm:$0xff] }
 0x1b7   : > { %4487 = vmatprep.subr.bf16.mxu1 %v5676_v47  ;;  %v2886_v47 = vld [vmem:[%s6569_s5 + $0x30] sm:$0xff] }
 0x1b8   : > { %4582 = vmatpush3.bf16.msra.mxu0 %v4581_v44  ;;  %v3714_v44 = vld [vmem:[%s6569_s5 + $0xc8] sm:$0xff] }
 0x1b9   : > { %4583 = vmatprep.subr.bf16.mxu0 %v4918_v51 }
 0x1ba   : > { %4489 = vmatpush1.bf16.msra.mxu1 %v5691_v58  ;;  %v2887_v58 = vld [vmem:[%s6569_s5 + $0x38] sm:$0xff] }
 0x1bb   : > { %4491 = vmatprep.subr.bf16.mxu1 %v5694_v61  ;;  %v4584_v61 = vpack.c.bf16 %v2887_v58, %v2886_v47  ;;  %v4611_v47 = vpack.c.bf16 %v3714_v44, %v3713_v34  ;;  %v3715_v58 = vld [vmem:[%s6569_s5 + $0xd0] sm:$0xff] }
 0x1bd   : > { %4585 = vmatpush3.bf16.msra.mxu0 %v4584_v61  ;;  %v3716_v61 = vld [vmem:[%s6569_s5 + $0xd8] sm:$0xff] }
 0x1be   : > { %4493 = vmatpush1.bf16.msra.mxu1 %v5709_v5  ;;  %v2888_v5 = vld [vmem:[%s6569_s5 + $0x40] sm:$0xff]  ;;  %4586 = vmatprep.subr.bf16.mxu0 %v4918_v51 }
 0x1bf   : > { %4495 = vmatprep.subr.bf16.mxu1 %v5712_v8  ;;  %v2889_v8 = vld [vmem:[%s6569_s5 + $0x48] sm:$0xff] }
 0x1c2   : > { %4497 = vmatpush1.bf16.msra.mxu1 %v5727_v60  ;;  %v4587_v60 = vpack.c.bf16 %v2889_v8, %v2888_v5  ;;  %v4614_v5 = vpack.c.bf16 %v3716_v61, %v3715_v58  ;;  %v3717_v8 = vld [vmem:[%s6569_s5 + $0xe0] sm:$0xff]  ;;  %v3252_v58 = vld [vmem:[%s6571_s7 + $0x68] sm:$0xff] }
 0x1c3   : > { %4499 = vmatprep.subr.bf16.mxu1 %v5730_v20  ;;  %v2890_v20 = vld [vmem:[%s6569_s5 + $0x50] sm:$0xff] }
 0x1c4   : > { %4588 = vmatpush3.bf16.msra.mxu0 %v4587_v60  ;;  %v3718_v60 = vld [vmem:[%s6569_s5 + $0xe8] sm:$0xff] }
 0x1c5   : > { %4589 = vmatprep.subr.bf16.mxu0 %v4918_v51 }
 0x1c6   : > { %4501 = vmatpush1.bf16.msra.mxu1 %v5745_v43  ;;  %v2891_v43 = vld [vmem:[%s6569_s5 + $0x58] sm:$0xff] }
 0x1c7   : > { %4503 = vmatprep.subr.bf16.mxu1 %v5748_v49  ;;  %v2792_v49 = vrot.slane %v5842_v25, 2  ;;  %v2895_v25 = vld [vmem:[%s6569_s5 + $0x78] sm:$0xff] }
 0x1ca   : > { %4505 = vmatpush1.bf16.msra.mxu1 %v5763_v2  ;;  %v4590_v2 = vpack.c.bf16 %v2891_v43, %v2890_v20  ;;  %v4617_v20 = vpack.c.bf16 %v3718_v60, %v3717_v8  ;;  %v3719_v43 = vld [vmem:[%s6569_s5 + $0xf0] sm:$0xff]  ;;  %v3330_v8 = vld [vmem:[%s6573_s9] sm:$0xff]  ;;  %v3331_v60 = vld [vmem:[%s6573_s9 + $0x8] sm:$0xff] }
 0x1cb   : > { %4507 = vmatprep.subr.bf16.mxu1 %v5766_v3 }
 0x1cc   : > { %4591 = vmatpush3.bf16.msra.mxu0 %v4590_v2 }
 0x1cd   : > { %4592 = vmatprep.subr.bf16.mxu0 %v4918_v51 }
 0x1ce   : > { %4509 = vmatpush1.bf16.msra.mxu1 %v6598_v38  ;;  %v3707_v38 = vld [vmem:[%s6569_s5 + $0x90] sm:$0xff] }
 0x1cf   : > { %4511 = vmatprep.subr.bf16.mxu1 %v6599_v39  ;;  %v3708_v39 = vld [vmem:[%s6569_s5 + $0x98] sm:$0xff] }
 0x1d0   : > { %v4602_v42 = vpack.c.bf16 %v3708_v39, %v3707_v38  ;;  %v3747_v39 = vld [vmem:[%s6569_s5 + $0x1d0] sm:$0xff] }
 0x1d1   : > { %2711 = vmatmul.mubr.f32.vlgmr.msra.gmra.mrb[8].mxu1 %v2321_v16  ;;  %v3244_v16 = vld [vmem:[%s6571_s7 + $0x28] sm:$0xff] }
 0x1d2   : > { %4513 = vmatpush1.bf16.msra.mxu1 %v5799_v53  ;;  %2783 = vmatprep.mubr.f32.mxu1 %v6596_v22 }
 0x1d3   : > { %4515 = vmatprep.subr.bf16.mxu1 %v5803_v6  ;;  %v2892_v6 = vld [vmem:[%s6569_s5 + $0x60] sm:$0xff] }
 0x1d6   : > { %4517 = vmatpush1.bf16.msra.mxu1 %v5820_v52  ;;  %v2893_v52 = vld [vmem:[%s6569_s5 + $0x68] sm:$0xff] }
 0x1d7   : > { %4519 = vmatprep.subr.bf16.mxu1 %v5824_v56  ;;  %v4593_v56 = vpack.c.bf16 %v2893_v52, %v2892_v6 }
 0x1d9   : > { %4594 = vmatpush3.bf16.msra.mxu0 %v4593_v56  ;;  %v3723_v56 = vld [vmem:[%s6569_s5 + $0x110] sm:$0xff] }
 0x1da   : > { %4521 = vmatpush1.bf16.msra.mxu1 %v5840_v12  ;;  %4595 = vmatprep.subr.bf16.mxu0 %v4918_v51  ;;  %v2894_v12 = vld [vmem:[%s6569_s5 + $0x70] sm:$0xff] }
 0x1db   : > { %4523 = vmatprep.subr.bf16.mxu1 %v5845_v35  ;;  %v4596_v35 = vpack.c.bf16 %v2895_v25, %v2894_v12  ;;  %v3724_v12 = vld [vmem:[%s6569_s5 + $0x118] sm:$0xff] }
 0x1dc   : > { %v4626_v25 = vpack.c.bf16 %v3724_v12, %v3723_v56  ;;  %v3334_v56 = vld [vmem:[%s6573_s9 + $0x20] sm:$0xff]  ;;  %v3335_v12 = vld [vmem:[%s6573_s9 + $0x28] sm:$0xff] }
 0x1dd   : > { %4597 = vmatpush3.bf16.msra.mxu0 %v4596_v35  ;;  %v3725_v35 = vld [vmem:[%s6569_s5 + $0x120] sm:$0xff] }
 0x1de   : > { %4525 = vmatpush1.bf16.msra.mxu1 %v5862_v26  ;;  %4598 = vmatprep.subr.bf16.mxu0 %v4918_v51 }
 0x1df   : > { %4527 = vmatprep.subr.bf16.mxu1 %v5866_v0 }
 0x1e2   : > { %4529 = vmatpush1.bf16.msra.mxu1 %v5883_v4 }
 0x1e3   : > { %4531 = vmatprep.subr.bf16.mxu1 %v5887_v1 }
 0x1e6   : > { %4533 = vmatpush1.bf16.msra.mxu1 %v5903_v10  ;;  %v3239_v10 = vld [vmem:[%s6571_s7] sm:$0xff] }
 0x1e7   : > { %4535 = vmatprep.subr.bf16.mxu1 %v5907_v40  ;;  %v3240_v40 = vld [vmem:[%s6571_s7 + $0x8] sm:$0xff] }
 0x1ea   : > { %4537 = vmatpush1.bf16.msra.mxu1 %v5923_v19  ;;  %v3241_v19 = vld [vmem:[%s6571_s7 + $0x10] sm:$0xff] }
 0x1eb   : > { %4539 = vmatprep.subr.bf16.mxu1 %v5927_v37  ;;  %v4671_v37 = vpack.c.bf16 %v3240_v40, %v3239_v10  ;;  %v3729_v40 = vld [vmem:[%s6569_s5 + $0x140] sm:$0xff] }
 0x1ee   : > { %4541 = vmatpush1.bf16.msra.mxu1 %v5943_v27  ;;  %v3242_v27 = vld [vmem:[%s6571_s7 + $0x18] sm:$0xff] }
 0x1ef   : > { %4543 = vmatprep.subr.bf16.mxu1 %v5947_v9  ;;  %v4674_v9 = vpack.c.bf16 %v3242_v27, %v3241_v19  ;;  %v3730_v19 = vld [vmem:[%s6569_s5 + $0x148] sm:$0xff]  ;;  %v3731_v27 = vld [vmem:[%s6569_s5 + $0x150] sm:$0xff] }
 0x1f1   : > { %2784 = vmatmul.mubr.f32.vlgmr.msra.gmra.mrb[8].mxu1 %v2429_v33 }
 0x1f2   : > { %4545 = vmatpush1.bf16.msra.mxu1 %v5963_v36  ;;  %2858 = vmatprep.mubr.f32.mxu1 %v6596_v22  ;;  %v3243_v36 = vld [vmem:[%s6571_s7 + $0x20] sm:$0xff] }
 0x1f3   : > { %4547 = vmatprep.subr.bf16.mxu1 %v5968_v7  ;;  %v4677_v7 = vpack.c.bf16 %v3244_v16, %v3243_v36  ;;  %v3733_v16 = vld [vmem:[%s6569_s5 + $0x160] sm:$0xff] }
 0x1f6   : > { %4549 = vmatpush1.bf16.msra.mxu1 %v5986_v46  ;;  %v3245_v46 = vld [vmem:[%s6571_s7 + $0x30] sm:$0xff] }
 0x1f7   : > { %4551 = vmatprep.subr.bf16.mxu1 %v5990_v13  ;;  %v3246_v13 = vld [vmem:[%s6571_s7 + $0x38] sm:$0xff] }
 0x1fa   : > { %4553 = vmatpush1.bf16.msra.mxu1 %v6007_v55  ;;  %v4680_v55 = vpack.c.bf16 %v3246_v13, %v3245_v46  ;;  %v3735_v13 = vld [vmem:[%s6569_s5 + $0x170] sm:$0xff] }
 0x1fb   : > { %4555 = vmatprep.subr.bf16.mxu1 %v6011_v17  ;;  %v3247_v17 = vld [vmem:[%s6571_s7 + $0x40] sm:$0xff] }
 0x1fe   : > { %4557 = vmatpush1.bf16.msra.mxu1 %v6029_v62  ;;  %v3248_v62 = vld [vmem:[%s6571_s7 + $0x48] sm:$0xff] }
 0x1ff   : > { %4559 = vmatprep.subr.bf16.mxu1 %v6033_v50  ;;  %v4683_v50 = vpack.c.bf16 %v3248_v62, %v3247_v17  ;;  %v3737_v62 = vld [vmem:[%s6569_s5 + $0x180] sm:$0xff] }
 0x202   : > { %4561 = vmatpush1.bf16.msra.mxu1 %v6050_v15  ;;  %v3249_v15 = vld [vmem:[%s6571_s7 + $0x50] sm:$0xff] }
 0x203   : > { %4563 = vmatprep.subr.bf16.mxu1 %v6054_v63  ;;  %v3250_v63 = vld [vmem:[%s6571_s7 + $0x58] sm:$0xff] }
 0x206   : > { %4565 = vmatpush1.bf16.msra.mxu1 %v6070_v21  ;;  %v4686_v21 = vpack.c.bf16 %v3250_v63, %v3249_v15 }
 0x207   : > { %4567 = vmatprep.subr.bf16.mxu1 %v6074_v11 }
 0x20a   : > { %4569 = vmatpush1.bf16.msra.mxu1 %v6090_v28 }
 0x20b   : > { %4571 = vmatprep.subr.bf16.mxu1 %v6094_v31  ;;  %v3705_v31 = vld [vmem:[%s6569_s5 + $0x80] sm:$0xff] }
 0x20e   : > { %4573 = vmatpush1.bf16.msra.mxu1 %v6104_v32  ;;  %v4599_v32 = vpack.c.bf16 %v3706_v18, %v3705_v31  ;;  %v3744_v31 = vld [vmem:[%s6569_s5 + $0x1b8] sm:$0xff] }
 0x20f   : > { %4670 = vmatprep.subr.bf16.mxu1 %v4918_v51 }
 0x211   : > { %2859 = vmatmul.mubr.f32.vlgmr.msra.gmra.mrb[8].mxu1 %v2792_v49  ;;  %v3720_v49 = vld [vmem:[%s6569_s5 + $0xf8] sm:$0xff] }
 0x212   : > { %4026 = vmatprep.mubr.msk.f32.mxu1 %vm4919_vm4, %v6596_v22  ;;  %4672 = vmatpush3.bf16.msra.mxu1 %v4671_v37  ;;  %v4620_v2 = vpack.c.bf16 %v3720_v49, %v3719_v43  ;;  %v4635_v37 = vpack.c.bf16 %v3730_v19, %v3729_v40  ;;  %v3340_v40 = vld [vmem:[%s6573_s9 + $0x50] sm:$0xf] }
 0x213   : > { %4673 = vmatprep.subr.bf16.mxu1 %v4918_v51 }
 0x216   : > { %4675 = vmatpush3.bf16.msra.mxu1 %v4674_v9  ;;  %v3732_v9 = vld [vmem:[%s6569_s5 + $0x158] sm:$0xff] }
 0x217   : > { %4676 = vmatprep.subr.bf16.mxu1 %v4918_v51  ;;  %v4638_v36 = vpack.c.bf16 %v3732_v9, %v3731_v27 }
 0x21a   : > { %4678 = vmatpush3.bf16.msra.mxu1 %v4677_v7  ;;  %v3734_v7 = vld [vmem:[%s6569_s5 + $0x168] sm:$0xff] }
 0x21b   : > { %4679 = vmatprep.subr.bf16.mxu1 %v4918_v51  ;;  %v4641_v46 = vpack.c.bf16 %v3734_v7, %v3733_v16 }
 0x21e   : > { %4681 = vmatpush3.bf16.msra.mxu1 %v4680_v55  ;;  %v3736_v55 = vld [vmem:[%s6569_s5 + $0x178] sm:$0xff] }
 0x21f   : > { %4682 = vmatprep.subr.bf16.mxu1 %v4918_v51  ;;  %v4644_v17 = vpack.c.bf16 %v3736_v55, %v3735_v13 }
 0x222   : > { %4684 = vmatpush3.bf16.msra.mxu1 %v4683_v50  ;;  %v3738_v50 = vld [vmem:[%s6569_s5 + $0x188] sm:$0xff] }
 0x223   : > { %4685 = vmatprep.subr.bf16.mxu1 %v4918_v51  ;;  %v4647_v15 = vpack.c.bf16 %v3738_v50, %v3737_v62 }
 0x226   : > { %4687 = vmatpush3.bf16.msra.mxu1 %v4686_v21  ;;  %v3739_v21 = vld [vmem:[%s6569_s5 + $0x190] sm:$0xff] }
 0x227   : > { %4688 = vmatprep.subr.bf16.mxu1 %v4918_v51 }
 0x244   : > { %v2102_v3 = vpop.f32.mrb[6].mxu1 }
 0x245   : > { %v2104_v53 = vpop.f32.mrb[7].mxu1 }
 0x27c   : > { %v2497_v26 = vpop.f32.mrb[4].mxu0 }
 0x27d   : > { %v4708_v0 = vadd.f32 %v2497_v26, %v2102_v3  ;;  %v2499_v4 = vpop.f32.mrb[5].mxu0  ;;  %v3721_v3 = vld [vmem:[%s6569_s5 + $0x100] sm:$0xff]  ;;  %v3726_v26 = vld [vmem:[%s6569_s5 + $0x128] sm:$0xff] }
 0x27e   : > { %v4709_v1 = vadd.f32 %v2499_v4, %v2104_v53  ;;  %v3722_v53 = vld [vmem:[%s6569_s5 + $0x108] sm:$0xff]  ;;  %v3727_v4 = vld [vmem:[%s6569_s5 + $0x130] sm:$0xff] }
 0x27f   : > { %v4623_v6 = vpack.c.bf16 %v3722_v53, %v3721_v3  ;;  %v3332_v53 = vld [vmem:[%s6573_s9 + $0x10] sm:$0xff] }
 0x2e4   : > { %v2860_v11 = vpop.f32.mrb[8].mxu1 }
 0x2e5   : > { %v2867_v14 = vmax.f32 %v4708_v0, %v2860_v11  ;;  %v2862_v41 = vpop.f32.mrb[9].mxu1  ;;  %v4629_v0 = vpack.c.bf16 %v3726_v26, %v3725_v35  ;;  %v3740_v11 = vld [vmem:[%s6569_s5 + $0x198] sm:$0xff]  ;;  %v3336_v35 = vld [vmem:[%s6573_s9 + $0x30] sm:$0xff] }
 0x2e6   : > { %v2868_v24 = vmax.f32 %v4709_v1, %v2862_v41  ;;  %v3728_v1 = vld [vmem:[%s6569_s5 + $0x138] sm:$0xff]  ;;  %v3741_v41 = vld [vmem:[%s6569_s5 + $0x1a0] sm:$0xff] }
 0x2e7   : > { %v4632_v10 = vpack.c.bf16 %v3728_v1, %v3727_v4  ;;  %v3337_v26 = vld [vmem:[%s6573_s9 + $0x38] sm:$0xff]  ;;  %v3338_v4 = vld [vmem:[%s6573_s9 + $0x40] sm:$0xff]  ;;  %v3339_v1 = vld [vmem:[%s6573_s9 + $0x48] sm:$0xff] }
 0x2e8   : > { %v2869_v28 = vmax.f32 %v2867_v14, %v2868_v24  ;;  %v4650_v14 = vpack.c.bf16 %v3740_v11, %v3739_v21  ;;  %v3742_v24 = vld [vmem:[%s6569_s5 + $0x1a8] sm:$0xff] }
 0x2ea   : > { %v2877_v23 = vadd.f32 %v3704_v59, %v2869_v28  ;;  %v4653_v59 = vpack.c.bf16 %v3742_v24, %v3741_v41  ;;  %v3743_v28 = vld [vmem:[%s6569_s5 + $0x1b0] sm:$0xff] }
 0x2eb   : > { %v4656_v18 = vpack.c.bf16 %v3744_v31, %v3743_v28 }
 0x2ec   : > { %v6283_v33 = vmax.f32 %v2877_v23, 0.0  ;;  %v3745_v23 = vld [vmem:[%s6569_s5 + $0x1c0] sm:$0xff] }
 0x2ee   : > { %3889 = vmatmul.mubr.f32.vlgmr.msra.gmra.mrb[6].mxu0 %v6283_v33  ;;  %v2985_v52 = vrot.slane %v6283_v33, 1  ;;  %v3075_v63 = vrot.slane %v6283_v33, 2  ;;  %v3165_v44 = vrot.slane %v6283_v33, 3  ;;  %v2879_v33 = vld [vmem:[%s6570_s6] sm:$0x1] }
 0x2ef   : > { %4600 = vmatpush3.bf16.msra.mxu0 %v4599_v32  ;;  %3923 = vmatprep.mubr.msk.f32.mxu0 %vm4919_vm4, %v6596_v22  ;;  %v3746_v32 = vld [vmem:[%s6569_s5 + $0x1c8] sm:$0xff] }
 0x2f0   : > { %4601 = vmatprep.subr.bf16.mxu0 %v4918_v51  ;;  %v4659_v38 = vpack.c.bf16 %v3746_v32, %v3745_v23 }
 0x2f3   : > { %4603 = vmatpush3.bf16.msra.mxu0 %v4602_v42  ;;  %v3748_v42 = vld [vmem:[%s6569_s5 + $0x1d8] sm:$0xff] }
 0x2f4   : > { %4604 = vmatprep.subr.bf16.mxu0 %v4918_v51  ;;  %v4662_v45 = vpack.c.bf16 %v3748_v42, %v3747_v39 }
 0x2f7   : > { %4606 = vmatpush3.bf16.msra.mxu0 %v4605_v54  ;;  %v3750_v54 = vld [vmem:[%s6569_s5 + $0x1e8] sm:$0xff] }
 0x2f8   : > { %4607 = vmatprep.subr.bf16.mxu0 %v4918_v51  ;;  %v4665_v57 = vpack.c.bf16 %v3750_v54, %v3749_v48 }
 0x2fb   : > { %4609 = vmatpush3.bf16.msra.mxu0 %v4608_v30  ;;  %v3752_v30 = vld [vmem:[%s6569_s5 + $0x1f8] sm:$0xff] }
 0x2fc   : > { %4610 = vmatprep.subr.bf16.mxu0 %v4918_v51  ;;  %v4668_v34 = vpack.c.bf16 %v3752_v30, %v3751_v29 }
 0x2ff   : > { %4612 = vmatpush3.bf16.msra.mxu0 %v4611_v47  ;;  %v3251_v47 = vld [vmem:[%s6571_s7 + $0x60] sm:$0xff] }
 0x300   : > { %4613 = vmatprep.subr.bf16.mxu0 %v4918_v51  ;;  %v4689_v61 = vpack.c.bf16 %v3252_v58, %v3251_v47 }
 0x302   : > { %4690 = vmatpush3.bf16.msra.mxu1 %v4689_v61 }
 0x303   : > { %4615 = vmatpush3.bf16.msra.mxu0 %v4614_v5  ;;  %4024 = vmatprep.subr.mxu1 %v6596_v22  ;;  %v3253_v5 = vld [vmem:[%s6571_s7 + $0x70] sm:$0xff] }
 0x304   : > { %4616 = vmatprep.subr.bf16.mxu0 %v4918_v51 }
 0x306   : > { %4025 = vmatpush3.msra.mxu1 %v3253_v5 }
 0x307   : > { %4618 = vmatpush3.bf16.msra.mxu0 %v4617_v20  ;;  %4691 = vmatprep.subr.bf16.mxu1 %v4918_v51 }
 0x308   : > { %4619 = vmatprep.subr.bf16.mxu0 %v4918_v51 }
 0x30b   : > { %4621 = vmatpush3.bf16.msra.mxu0 %v4620_v2  ;;  %v4692_v2 = vpack.c.bf16 %v3331_v60, %v3330_v8 }
 0x30c   : > { %4622 = vmatprep.subr.bf16.mxu0 %v4918_v51 }
 0x30e   : > { %3924 = vmatmul.mubr.f32.vlgmr.msra.gmra.mrb[6].mxu0 %v2985_v52 }
 0x30f   : > { %4624 = vmatpush3.bf16.msra.mxu0 %v4623_v6  ;;  %3958 = vmatprep.mubr.msk.f32.mxu0 %vm4919_vm4, %v6596_v22  ;;  %v3333_v6 = vld [vmem:[%s6573_s9 + $0x18] sm:$0xff] }
 0x310   : > { %4625 = vmatprep.subr.bf16.mxu0 %v4918_v51  ;;  %v4695_v52 = vpack.c.bf16 %v3333_v6, %v3332_v53 }
 0x313   : > { %4627 = vmatpush3.bf16.msra.mxu0 %v4626_v25  ;;  %v4698_v25 = vpack.c.bf16 %v3335_v12, %v3334_v56 }
 0x314   : > { %4628 = vmatprep.subr.bf16.mxu0 %v4918_v51 }
 0x317   : > { %4630 = vmatpush3.bf16.msra.mxu0 %v4629_v0  ;;  %v4701_v0 = vpack.c.bf16 %v3337_v26, %v3336_v35 }
 0x318   : > { %4631 = vmatprep.subr.bf16.mxu0 %v4918_v51 }
 0x31b   : > { %4633 = vmatpush3.bf16.msra.mxu0 %v4632_v10  ;;  %v4704_v10 = vpack.c.bf16 %v3339_v1, %v3338_v4 }
 0x31c   : > { %4634 = vmatprep.subr.bf16.mxu0 %v4918_v51 }
 0x31f   : > { %4636 = vmatpush3.bf16.msra.mxu0 %v4635_v37 }
 0x320   : > { %4637 = vmatprep.subr.bf16.mxu0 %v4918_v51 }
 0x323   : > { %4639 = vmatpush3.bf16.msra.mxu0 %v4638_v36 }
 0x324   : > { %4640 = vmatprep.subr.bf16.mxu0 %v4918_v51 }
 0x327   : > { %4642 = vmatpush3.bf16.msra.mxu0 %v4641_v46 }
 0x328   : > { %4643 = vmatprep.subr.bf16.mxu0 %v4918_v51 }
 0x32b   : > { %4645 = vmatpush3.bf16.msra.mxu0 %v4644_v17 }
 0x32c   : > { %4646 = vmatprep.subr.bf16.mxu0 %v4918_v51 }
 0x32e   : > { %3959 = vmatmul.mubr.f32.vlgmr.msra.gmra.mrb[6].mxu0 %v3075_v63 }
 0x32f   : > { %4648 = vmatpush3.bf16.msra.mxu0 %v4647_v15  ;;  %3993 = vmatprep.mubr.msk.f32.mxu0 %vm4919_vm4, %v6596_v22 }
 0x330   : > { %4649 = vmatprep.subr.bf16.mxu0 %v4918_v51 }
 0x333   : > { %4651 = vmatpush3.bf16.msra.mxu0 %v4650_v14 }
 0x334   : > { %4652 = vmatprep.subr.bf16.mxu0 %v4918_v51 }
 0x337   : > { %4654 = vmatpush3.bf16.msra.mxu0 %v4653_v59 }
 0x338   : > { %4655 = vmatprep.subr.bf16.mxu0 %v4918_v51 }
 0x33b   : > { %4657 = vmatpush3.bf16.msra.mxu0 %v4656_v18 }
 0x33c   : > { %4658 = vmatprep.subr.bf16.mxu0 %v4918_v51 }
 0x33f   : > { %4660 = vmatpush3.bf16.msra.mxu0 %v4659_v38 }
 0x340   : > { %4661 = vmatprep.subr.bf16.mxu0 %v4918_v51 }
 0x343   : > { %4663 = vmatpush3.bf16.msra.mxu0 %v4662_v45 }
 0x344   : > { %4664 = vmatprep.subr.bf16.mxu0 %v4918_v51 }
 0x347   : > { %4666 = vmatpush3.bf16.msra.mxu0 %v4665_v57 }
 0x348   : > { %4667 = vmatprep.subr.bf16.mxu0 %v4918_v51 }
 0x34b   : > { %4669 = vmatpush3.bf16.msra.mxu0 %v4668_v34 }
 0x34e   : > { %3994 = vmatmul.mubr.f32.vlgmr.msra.gmra.mrb[6].mxu0 %v3165_v44 }
 0x421   : > { %v3233_v20 = vpop.f32.mrb[6].mxu0 }
 0x422   : > { %v4710_v43 = vadd.f32 %v3233_v20, %v2879_v33  ;;  %v3995_v49 = vpop.f32.mrb[7].mxu0 }
 0x424   : > { %v3238_v3 = vmax.f32 %v4710_v43, 0.0 }
 0x426   : > { %4027 = vmatmul.mubr.msk.f32.vlgmr.msra.gmra.mrb[10].mxu1 %vm3255_vm5, %v3238_v3 }
 0x427   : > { %4693 = vmatpush3.bf16.msra.mxu1 %v4692_v2  ;;  %4051 = vmatprep.mubr.msk.f32.mxu1 %vm4919_vm4, %v6596_v22 }
 0x428   : > { %4694 = vmatprep.subr.bf16.mxu1 %v4918_v51 }
 0x42b   : > { %4696 = vmatpush3.bf16.msra.mxu1 %v4695_v52 }
 0x42c   : > { %4697 = vmatprep.subr.bf16.mxu1 %v4918_v51 }
 0x42f   : > { %4699 = vmatpush3.bf16.msra.mxu1 %v4698_v25 }
 0x430   : > { %4700 = vmatprep.subr.bf16.mxu1 %v4918_v51 }
 0x433   : > { %4702 = vmatpush3.bf16.msra.mxu1 %v4701_v0 }
 0x434   : > { %4703 = vmatprep.subr.bf16.mxu1 %v4918_v51  ;;  %v3254_v51 = vld [vmem:[%s6572_s8] sm:$0x1] }
 0x437   : > { %4705 = vmatpush3.bf16.msra.mxu1 %v4704_v10 }
 0x438   : > { %4049 = vmatprep.subr.mxu1 %v6596_v22  ;;  %v3341_v22 = vld [vmem:[%s6574_s10] sm:$0x1] }
 0x43b   : > { %4050 = vmatpush3.msk.msra.mxu1 %vm423_vm0, %v3340_v40 }
 0x4f9   : > { %v3325_v19 = vpop.f32.mrb[10].mxu1 }
 0x4fa   : > { %v3326_v37 = vadd.f32 %v3325_v19, %v3254_v51  ;;  %v4028_v27 = vpop.f32.mrb[11].mxu1 }
 0x4fc   : > { %v3329_v9 = vmax.f32 %v3326_v37, 0.0 }
 0x4fe   : > { %4052 = vmatmul.mubr.msk.f32.vlgmr.msra.gmra.mrb[12].mxu1 %vm3342_vm6, %v3329_v9 }
 0x5d1   : > { %v3415_v36 = vpop.f32.mrb[12].mxu1 }
 0x5d2   : > { %v3416_v16 = vadd.f32 %v3415_v36, %v3341_v22  ;;  %v4053_v7 = vpop.f32.mrb[13].mxu1 }
 0x5d4   : > { %3420 = vst.msk [vmem:[%s393_s26] sm:$0x1] %vm3419_vm7, %v3416_v16 }
 0x5d5   : > { %4858 = shalt.err (!%p4855_p7)
}
 0x5d6   : > { %s4859_s14 = scalar_lea.hbm %s6522_s16, 16  ;;  %s4863_s12 = scalar_lea.hbm %s6575_s11, 32 }
 0x5d7   : > { %p4860_p8 = scmp.ne.s32.totalorder %s6522_s16, %s4859_s14  ;;  %p4864_p1 = scmp.lt.u32.totalorder %s6522_s16, %s6575_s11 }
 0x5d8   : > { %p4865_p0 = scmp.lt.u32.totalorder %s4863_s12, %s4859_s14  ;;  %p4867_p6 = scmp.lt.u32.totalorder %s4859_s14, %s6522_s16 }
 0x5d9   : > { %p4861_p11 = pnand %p4860_p8, %p6600_p9 }
 0x5da   : > { %p4866_p5 = por %p4865_p0, %p4864_p1 }
 0x5db   : > { %p4862_p13 = pneg %p4861_p11 }
 0x5dc   : > { %p4868_p10 = por %p4867_p6, %p4866_p5 }
 0x5de   : > { %p4869_p12 = pnand %p4868_p10, %p4862_p13 }
 0x5e0   : > { %4872 = shalt.err (!%p4869_p12)
}
 0x5e1   : > { %4765 = dma.vmem_to_hbm [thread:$0]  (%p6600_p9), %s6524_s29, 16, %s6522_s16, %s3422_s25  }
 0x5e2 PF: > { %p4777_p2 = scmp.ge.s32.totalorder %s4911_s20, 2  ;;  %s3446_s30 = sand.u32 1, %s4899_s17  }
 0x5e3   : > { %p6601_p3 = scmp.ne.s32.totalorder %s6586_s28, 0  ;;  %s3447_s15 = scalar_lea.sflag [#allocation4], %s3446_s30 }
 0x5e5   : > { %p4772_p4 = pnand %p4777_p2, %p6601_p3 }
 0x5e7   : > { %4894 = dma.done.wait (!%p4772_p4), %s3447_s15, 16  }
 0x5e8   : > { %4896 = vsyncadd (!%p4772_p4), %s3447_s15, 4294967280  ;;  %s6602_s22 = sld [smem:[#allocation8_spill]]  ;;  %p22_p7 = scmp.ge.s32.totalorder %s5006_s23, 4  }
 0x5e9   : > { %s6603_s17 = smov %s4903_s18  ;;  %s6604_s18 = smov %s4907_s19 }
 0x5ea   : > { %s6606_s20 = smov %s5006_s23  ;;  %24 = sbr.rel (!%p22_p7) target bundleno = 4 (0x4), region = 118 }
 0x5ee   : > { %s6605_s19 = smov %s6602_s22 }
 0x5f1   :  { %3451 = vsyncpa [#allocation3], 1 }
 0x5f2   :  { %3453 = vsyncpa [#allocation3 + $0x1], 1 }
 0x5f3   :  { %3454 = vsyncpa [#allocation4], 1 }
 0x5f4   :  { %3456 = vsyncpa [#allocation4 + $0x1], 1 }

</bundles_post_ra>
